<compile_context>
chip_gen: v7x
topology: tpu7x:2x2x1
jax: 0.10.0
libtpu: 0.0.40
codegen_flags: <defaults>
</compile_context>

<pallas_src>
import math

import jax
import jax.numpy as jnp
from jax import lax
from jax.experimental import pallas as pl
from jax.experimental.pallas import tpu as pltpu


def _round_up(x, m):
    return ((x + m - 1) // m) * m


def _pick_time_chunk(T, target=16):
    tt = min(T, target)
    while T % tt != 0:
        tt -= 1
    return tt


# ---------------- hoisted (non-recurrent) input projection: X @ W^T + b ----------------
def _proj_kernel(x_ref, w_ref, b_ref, o_ref):
    o_ref[...] = (jnp.dot(x_ref[...], w_ref[...], preferred_element_type=jnp.float32)
                  + b_ref[...])


def proj_matmul(x, w_t, b):
    """x: (M, K), w_t: (K, N), b: (N,) -> (M, N). Single VMEM tile (small shapes)."""
    M, K = x.shape
    N = w_t.shape[1]
    return pl.pallas_call(
        _proj_kernel,
        out_shape=jax.ShapeDtypeStruct((M, N), jnp.float32),
        grid=(1,),
        in_specs=[
            pl.BlockSpec((M, K), lambda i: (0, 0)),
            pl.BlockSpec((K, N), lambda i: (0, 0)),
            pl.BlockSpec((1, N), lambda i: (0, 0)),
        ],
        out_specs=pl.BlockSpec((M, N), lambda i: (0, 0)),
    )(x, w_t, b.reshape(1, -1))


# --------------- fused 2-layer GRU recurrence + fc1/relu/fc2 head kernel ---------------
def _fused_gru_head_kernel(gx1_ref, h0_ref,
                           w_hh1_ref, b_hh1_ref,
                           w_ih2_ref, b_ih2_ref, w_hh2_ref, b_hh2_ref,
                           fc1_w_ref, fc1_b_ref, fc2_w_ref, fc2_b_ref,
                           out_ref, h1_scr, h2_scr):
    c = pl.program_id(1)
    n_chunks = pl.num_programs(1)
    H = h1_scr.shape[-1]
    Tt = gx1_ref.shape[0]

    @pl.when(c == 0)
    def _():
        h1_scr[...] = h0_ref[0]
        h2_scr[...] = h0_ref[1]

    def gru_cell(gx, gh, h_prev):
        r = jax.nn.sigmoid(gx[:, 0:H] + gh[:, 0:H])
        z = jax.nn.sigmoid(gx[:, H:2 * H] + gh[:, H:2 * H])
        n = jnp.tanh(gx[:, 2 * H:3 * H] + r * gh[:, 2 * H:3 * H])
        return (1.0 - z) * n + z * h_prev

    def step(tt, carry):
        h1 = h1_scr[...]
        h2 = h2_scr[...]
        # Layer 1: input projection was precomputed (gx1 already includes b_ih1).
        gh1 = (jnp.dot(h1, w_hh1_ref[...], preferred_element_type=jnp.float32)
               + b_hh1_ref[...])
        h1_new = gru_cell(gx1_ref[tt], gh1, h1)
        # Layer 2 consumes layer-1's fresh hidden state directly (no HBM round trip).
        gx2 = (jnp.dot(h1_new, w_ih2_ref[...], preferred_element_type=jnp.float32)
               + b_ih2_ref[...])
        gh2 = (jnp.dot(h2, w_hh2_ref[...], preferred_element_type=jnp.float32)
               + b_hh2_ref[...])
        h2_new = gru_cell(gx2, gh2, h2)
        h1_scr[...] = h1_new
        h2_scr[...] = h2_new
        return carry

    lax.fori_loop(0, Tt, step, 0, unroll=True)

    # Head fused into the final time chunk: only (B_tile, L_pad) logits leave VMEM.
    @pl.when(c == n_chunks - 1)
    def _():
        last = h2_scr[...]
        h = (jnp.dot(last, fc1_w_ref[...], preferred_element_type=jnp.float32)
             + fc1_b_ref[...])
        h = jnp.maximum(h, 0.0)
        out_ref[...] = (jnp.dot(h, fc2_w_ref[...], preferred_element_type=jnp.float32)
                        + fc2_b_ref[...])


def fused_gru_head(gx1, h0, w_hh1_t, b_hh1, w_ih2_t, b_ih2, w_hh2_t, b_hh2,
                   fc1_w_t, fc1_b, fc2_w_t, fc2_b, *, time_chunk):
    T, B_pad, G = gx1.shape
    H = h0.shape[-1]
    H2 = fc1_w_t.shape[1]
    L_pad = fc2_w_t.shape[1]
    n_chunks = T // time_chunk

    # Leading "parallel" batch axis: shards the recurrence across TensorCores (v7x)
    # when the padded batch supports >=2 sublane-aligned tiles; 1 tile at small B.
    n_btiles = 2 if (B_pad % 16 == 0) else 1
    B_tile = B_pad // n_btiles

    return pl.pallas_call(
        _fused_gru_head_kernel,
        out_shape=jax.ShapeDtypeStruct((B_pad, L_pad), jnp.float32),
        grid_spec=pltpu.PrefetchScalarGridSpec(
            num_scalar_prefetch=0,
            grid=(n_btiles, n_chunks),
            in_specs=[
                pl.BlockSpec((time_chunk, B_tile, G), lambda b, c: (c, b, 0)),  # gx1 chunk
                pl.BlockSpec((2, B_tile, H), lambda b, c: (0, b, 0)),           # h0
                pl.BlockSpec((H, G), lambda b, c: (0, 0)),                      # W_hh1^T
                pl.BlockSpec((1, G), lambda b, c: (0, 0)),                      # b_hh1
                pl.BlockSpec((H, G), lambda b, c: (0, 0)),                      # W_ih2^T
                pl.BlockSpec((1, G), lambda b, c: (0, 0)),                      # b_ih2
                pl.BlockSpec((H, G), lambda b, c: (0, 0)),                      # W_hh2^T
                pl.BlockSpec((1, G), lambda b, c: (0, 0)),                      # b_hh2
                pl.BlockSpec((H, H2), lambda b, c: (0, 0)),                     # fc1 W^T
                pl.BlockSpec((1, H2), lambda b, c: (0, 0)),                     # fc1 b
                pl.BlockSpec((H2, L_pad), lambda b, c: (0, 0)),                 # fc2 W^T (padded)
                pl.BlockSpec((1, L_pad), lambda b, c: (0, 0)),                  # fc2 b (padded)
            ],
            out_specs=pl.BlockSpec((B_tile, L_pad), lambda b, c: (b, 0)),
            scratch_shapes=[pltpu.VMEM((B_tile, H), jnp.float32),
                            pltpu.VMEM((B_tile, H), jnp.float32)],
        ),
        compiler_params=pltpu.CompilerParams(
            dimension_semantics=("parallel", "arbitrary")),
    )(gx1, h0, w_hh1_t, b_hh1.reshape(1, -1), w_ih2_t, b_ih2.reshape(1, -1),
      w_hh2_t, b_hh2.reshape(1, -1), fc1_w_t, fc1_b.reshape(1, -1),
      fc2_w_t, fc2_b.reshape(1, -1))


# ------------------------------------ full forward ------------------------------------
@jax.jit
def embedded_gru_forward(token_ids, params, h0):
    B, T = token_ids.shape
    assert len(params["gru"]) == 2, "kernel fuses exactly two GRU layers"
    w_ih1, w_hh1, b_ih1, b_hh1 = params["gru"][0]
    w_ih2, w_hh2, b_ih2, b_hh2 = params["gru"][1]
    H = w_hh1.shape[1]
    D = w_ih1.shape[1]
    L = params["fc2_w"].shape[0]

    B_pad = _round_up(B, 8)      # sublane alignment
    L_pad = _round_up(L, 128)    # lane-dense output store
    Tt = _pick_time_chunk(T)

    # Time-major embedding gather straight from the table (no (B,T,D)->(T,B,D) copy).
    # TODO(synk): the gather itself stays in JAX (data-dependent, no rectangular BlockSpec).
    emb_tm = jnp.take(params["embedding"], token_ids.T, axis=0).astype(jnp.float32)  # (T,B,D)
    emb_tm = jnp.pad(emb_tm, ((0, 0), (0, B_pad - B), (0, 0)))

    # Hoisted layer-1 input projection as one big matmul (includes b_ih1).
    gx1 = proj_matmul(emb_tm.reshape(T * B_pad, D), w_ih1.T, b_ih1)
    gx1 = gx1.reshape(T, B_pad, 3 * H)

    h0_p = jnp.pad(h0.astype(jnp.float32), ((0, 0), (0, B_pad - B), (0, 0)))

    fc2_w_t = jnp.pad(params["fc2_w"].T, ((0, 0), (0, L_pad - L)))
    fc2_b = jnp.pad(params["fc2_b"], (0, L_pad - L))

    logits = fused_gru_head(
        gx1, h0_p,
        w_hh1.T, b_hh1,
        w_ih2.T, b_ih2, w_hh2.T, b_hh2,
        params["fc1_w"].T, params["fc1_b"],
        fc2_w_t, fc2_b,
        time_chunk=Tt)
    return logits[:B, :L]


# --------------------------------- pure-JAX reference ----------------------------------
def reference_forward(token_ids, params, h0):
    emb = jnp.take(params["embedding"], token_ids, axis=0)
    x_seq = jnp.transpose(emb, (1, 0, 2))
    for layer in range(len(params["gru"])):
        w_ih, w_hh, b_ih, b_hh = params["gru"][layer]
        H = w_hh.shape[1]
        h = h0[layer]
        outs = []
        for t in range(x_seq.shape[0]):
            gx = x_seq[t] @ w_ih.T + b_ih
            gh = h @ w_hh.T + b_hh
            r = jax.nn.sigmoid(gx[:, :H] + gh[:, :H])
            z = jax.nn.sigmoid(gx[:, H:2 * H] + gh[:, H:2 * H])
            n = jnp.tanh(gx[:, 2 * H:] + r * gh[:, 2 * H:])
            h = (1.0 - z) * n + z * h
            outs.append(h)
        x_seq = jnp.stack(outs, axis=0)
    last = x_seq[-1]
    h1 = jnp.maximum(last @ params["fc1_w"].T + params["fc1_b"], 0.0)
    return h1 @ params["fc2_w"].T + params["fc2_b"]


# ----------------------------------- parameter init ------------------------------------
def init_params(key, vocab_size, D, H, num_layers, num_labels):
    keys = jax.random.split(key, 1 + 4 * num_layers + 4)
    k = iter(keys)

    emb = jax.random.normal(next(k), (vocab_size, D), jnp.float32) * 0.1
    emb = emb.at[0].set(0.0)  # padding_idx = 0

    gru = []
    for layer in range(num_layers):
        din = D if layer == 0 else H
        s = 1.0 / math.sqrt(H)
        w_ih = jax.random.uniform(next(k), (3 * H, din), jnp.float32, -s, s)
        w_hh = jax.random.uniform(next(k), (3 * H, H), jnp.float32, -s, s)
        b_ih = jax.random.uniform(next(k), (3 * H,), jnp.float32, -s, s)
        b_hh = jax.random.uniform(next(k), (3 * H,), jnp.float32, -s, s)
        gru.append((w_ih, w_hh, b_ih, b_hh))

    s1 = 1.0 / math.sqrt(H)
    fc1_w = jax.random.uniform(next(k), (2 * H, H), jnp.float32, -s1, s1)
    fc1_b = jax.random.uniform(next(k), (2 * H,), jnp.float32, -s1, s1)
    s2 = 1.0 / math.sqrt(2 * H)
    fc2_w = jax.random.uniform(next(k), (num_labels, 2 * H), jnp.float32, -s2, s2)
    fc2_b = jax.random.uniform(next(k), (num_labels,), jnp.float32, -s2, s2)

    return {"embedding": emb, "gru": tuple(gru),
            "fc1_w": fc1_w, "fc1_b": fc1_b, "fc2_w": fc2_w, "fc2_b": fc2_b}


if __name__ == "__main__":
    # Small shapes consistent with the module (scaled down from 300/128/4).
    B, T = 2, 8
    vocab_size = 50
    D = 64           # input_features
    H = 32           # hidden_nodes
    num_layers = 2
    num_labels = 4

    root = jax.random.PRNGKey(0)
    k_par, k_tok, k_h0 = jax.random.split(root, 3)

    params = init_params(k_par, vocab_size, D, H, num_layers, num_labels)

    token_ids = jax.random.randint(k_tok, (B, T), 0, vocab_size, dtype=jnp.int32)

    # h0: xavier_normal_ on a (num_layers, B, H) tensor, reproduced with a fixed key.
    xavier_std = math.sqrt(2.0 / (B * H + num_layers * H))
    h0 = jax.random.normal(k_h0, (num_layers, B, H), jnp.float32) * xavier_std

    out = embedded_gru_forward(token_ids, params, h0)
    out = jax.block_until_ready(out)

    ref = reference_forward(token_ids, params, h0)
    assert out.shape == (B, num_labels)
    assert jnp.allclose(out, ref, atol=1e-4, rtol=1e-4), "Pallas output mismatch vs reference"

    print("KERNEL_OK")
</pallas_src>

<mosaic_0001>
module attributes {stable_mosaic.version = 11 : i64} {
  func.func @_proj_kernel(%arg0: i32, %arg1: memref<64x64xf32, #tpu.memory_space<vmem>>, %arg2: memref<64x96xf32, #tpu.memory_space<vmem>>, %arg3: memref<1x96xf32, #tpu.memory_space<vmem>>, %arg4: memref<64x96xf32, #tpu.memory_space<vmem>>) attributes {dimension_semantics = [#tpu.dimension_semantics<arbitrary>], iteration_bounds = array<i64: 1>, scalar_prefetch = 0 : i64, scratch_operands = 0 : i64, tpu.core_type = #tpu.core_type<tc>, window_params = [{pipeline_mode = #tpu.pipeline_mode<synchronous>, transform_indices = @transform_0, window_bounds = array<i64: 64, 64>}, {pipeline_mode = #tpu.pipeline_mode<synchronous>, transform_indices = @transform_1, window_bounds = array<i64: 64, 96>}, {pipeline_mode = #tpu.pipeline_mode<synchronous>, transform_indices = @transform_2, window_bounds = array<i64: 1, 96>}, {pipeline_mode = #tpu.pipeline_mode<synchronous>, transform_indices = @transform_3, window_bounds = array<i64: 64, 96>}]} {
    %c0 = arith.constant 0 : index
    %c0_0 = arith.constant 0 : index
    %0 = vector.load %arg1[%c0, %c0_0] : memref<64x64xf32, #tpu.memory_space<vmem>>, vector<64x64xf32>
    %c0_1 = arith.constant 0 : index
    %c0_2 = arith.constant 0 : index
    %1 = vector.load %arg2[%c0_1, %c0_2] : memref<64x96xf32, #tpu.memory_space<vmem>>, vector<64x96xf32>
    %cst = arith.constant dense<0.000000e+00> : vector<64x96xf32>
    %2 = tpu.matmul %0, %1, %cst {dimension_numbers = #tpu.dot_dimension_numbers<[1], [0], [0], [1], [0, 0, 1, 1], [], []>} : vector<64x64xf32>, vector<64x96xf32>, vector<64x96xf32> -> vector<64x96xf32>
    %c0_3 = arith.constant 0 : index
    %c0_4 = arith.constant 0 : index
    %3 = vector.load %arg3[%c0_3, %c0_4] : memref<1x96xf32, #tpu.memory_space<vmem>>, vector<1x96xf32>
    %4 = vector.broadcast %3 : vector<1x96xf32> to vector<64x96xf32>
    %5 = arith.addf %2, %4 : vector<64x96xf32>
    %c0_5 = arith.constant 0 : index
    %c0_6 = arith.constant 0 : index
    %6 = vector.load %arg4[%c0_5, %c0_6] : memref<64x96xf32, #tpu.memory_space<vmem>>, vector<64x96xf32>
    tpu.vector_store %arg4[%c0_5, %c0_6], %5 {strides = array<i32>} : memref<64x96xf32, #tpu.memory_space<vmem>>, vector<64x96xf32>,
    return
  }
  func.func @transform_0(%arg0: i32) -> (i32, i32) {
    %c0_i32 = arith.constant 0 : i32
    %c0_i32_0 = arith.constant 0 : i32
    %c0_i32_1 = arith.constant 0 : i32
    return %c0_i32, %c0_i32_0 : i32, i32
  }
  func.func @transform_1(%arg0: i32) -> (i32, i32) {
    %c0_i32 = arith.constant 0 : i32
    %c0_i32_0 = arith.constant 0 : i32
    %c0_i32_1 = arith.constant 0 : i32
    return %c0_i32, %c0_i32_0 : i32, i32
  }
  func.func @transform_2(%arg0: i32) -> (i32, i32) {
    %c0_i32 = arith.constant 0 : i32
    %c0_i32_0 = arith.constant 0 : i32
    %c0_i32_1 = arith.constant 0 : i32
    return %c0_i32, %c0_i32_0 : i32, i32
  }
  func.func @transform_3(%arg0: i32) -> (i32, i32) {
    %c0_i32 = arith.constant 0 : i32
    %c0_i32_0 = arith.constant 0 : i32
    %c0_i32_1 = arith.constant 0 : i32
    return %c0_i32, %c0_i32_0 : i32, i32
  }
}

module attributes {stable_mosaic.version = 11 : i64} {
  func.func @_fused_gru_head_kernel(%arg0: i32, %arg1: i32, %arg2: memref<8x8x96xf32, #tpu.memory_space<vmem>>, %arg3: memref<2x8x32xf32, #tpu.memory_space<vmem>>, %arg4: memref<32x96xf32, #tpu.memory_space<vmem>>, %arg5: memref<1x96xf32, #tpu.memory_space<vmem>>, %arg6: memref<32x96xf32, #tpu.memory_space<vmem>>, %arg7: memref<1x96xf32, #tpu.memory_space<vmem>>, %arg8: memref<32x96xf32, #tpu.memory_space<vmem>>, %arg9: memref<1x96xf32, #tpu.memory_space<vmem>>, %arg10: memref<32x64xf32, #tpu.memory_space<vmem>>, %arg11: memref<1x64xf32, #tpu.memory_space<vmem>>, %arg12: memref<64x128xf32, #tpu.memory_space<vmem>>, %arg13: memref<1x128xf32, #tpu.memory_space<vmem>>, %arg14: memref<8x128xf32, #tpu.memory_space<vmem>>, %arg15: memref<8x32xf32, #tpu.memory_space<vmem>>, %arg16: memref<8x32xf32, #tpu.memory_space<vmem>>) attributes {dimension_semantics = [#tpu.dimension_semantics<parallel>, #tpu.dimension_semantics<arbitrary>], iteration_bounds = array<i64: 1, 1>, scalar_prefetch = 0 : i64, scratch_operands = 2 : i64, tpu.core_type = #tpu.core_type<tc>, window_params = [{transform_indices = @transform_0, window_bounds = array<i64: 8, 8, 96>}, {transform_indices = @transform_1, window_bounds = array<i64: 2, 8, 32>}, {pipeline_mode = #tpu.pipeline_mode<synchronous>, transform_indices = @transform_2, window_bounds = array<i64: 32, 96>}, {pipeline_mode = #tpu.pipeline_mode<synchronous>, transform_indices = @transform_3, window_bounds = array<i64: 1, 96>}, {pipeline_mode = #tpu.pipeline_mode<synchronous>, transform_indices = @transform_4, window_bounds = array<i64: 32, 96>}, {pipeline_mode = #tpu.pipeline_mode<synchronous>, transform_indices = @transform_5, window_bounds = array<i64: 1, 96>}, {pipeline_mode = #tpu.pipeline_mode<synchronous>, transform_indices = @transform_6, window_bounds = array<i64: 32, 96>}, {pipeline_mode = #tpu.pipeline_mode<synchronous>, transform_indices = @transform_7, window_bounds = array<i64: 1, 96>}, {pipeline_mode = #tpu.pipeline_mode<synchronous>, transform_indices = @transform_8, window_bounds = array<i64: 32, 64>}, {pipeline_mode = #tpu.pipeline_mode<synchronous>, transform_indices = @transform_9, window_bounds = array<i64: 1, 64>}, {pipeline_mode = #tpu.pipeline_mode<synchronous>, transform_indices = @transform_10, window_bounds = array<i64: 64, 128>}, {pipeline_mode = #tpu.pipeline_mode<synchronous>, transform_indices = @transform_11, window_bounds = array<i64: 1, 128>}, {transform_indices = @transform_12, window_bounds = array<i64: 8, 128>}]} {
    %c0_i32 = arith.constant 0 : i32
    %0 = arith.cmpi eq, %arg1, %c0_i32 : i32
    %1 = arith.extui %0 : i1 to i32
    %c0_i32_0 = arith.constant 0 : i32
    %2 = arith.cmpi ne, %1, %c0_i32_0 : i32
    scf.if %2 {
      %c0_250 = arith.constant 0 : index
      %c0_251 = arith.constant 0 : index
      %c0_252 = arith.constant 0 : index
      %598 = vector.load %arg3[%c0_250, %c0_251, %c0_252] : memref<2x8x32xf32, #tpu.memory_space<vmem>>, vector<1x8x32xf32>
      %599 = vector.shape_cast %598 : vector<1x8x32xf32> to vector<8x32xf32>
      %c0_253 = arith.constant 0 : index
      %c0_254 = arith.constant 0 : index
      %600 = vector.load %arg15[%c0_253, %c0_254] : memref<8x32xf32, #tpu.memory_space<vmem>>, vector<8x32xf32>
      tpu.vector_store %arg15[%c0_253, %c0_254], %599 {strides = array<i32>} : memref<8x32xf32, #tpu.memory_space<vmem>>, vector<8x32xf32>,
      %c1 = arith.constant 1 : index
      %c0_255 = arith.constant 0 : index
      %c0_256 = arith.constant 0 : index
      %601 = vector.load %arg3[%c1, %c0_255, %c0_256] : memref<2x8x32xf32, #tpu.memory_space<vmem>>, vector<1x8x32xf32>
      %602 = vector.shape_cast %601 : vector<1x8x32xf32> to vector<8x32xf32>
      %c0_257 = arith.constant 0 : index
      %c0_258 = arith.constant 0 : index
      %603 = vector.load %arg16[%c0_257, %c0_258] : memref<8x32xf32, #tpu.memory_space<vmem>>, vector<8x32xf32>
      tpu.vector_store %arg16[%c0_257, %c0_258], %602 {strides = array<i32>} : memref<8x32xf32, #tpu.memory_space<vmem>>, vector<8x32xf32>,
    } else {
    }
    %c0_i32_1 = arith.constant 0 : i32
    %c0 = arith.constant 0 : index
    %c0_2 = arith.constant 0 : index
    %3 = vector.load %arg15[%c0, %c0_2] : memref<8x32xf32, #tpu.memory_space<vmem>>, vector<8x32xf32>
    %c0_3 = arith.constant 0 : index
    %c0_4 = arith.constant 0 : index
    %4 = vector.load %arg16[%c0_3, %c0_4] : memref<8x32xf32, #tpu.memory_space<vmem>>, vector<8x32xf32>
    %c0_5 = arith.constant 0 : index
    %c0_6 = arith.constant 0 : index
    %5 = vector.load %arg4[%c0_5, %c0_6] : memref<32x96xf32, #tpu.memory_space<vmem>>, vector<32x96xf32>
    %cst = arith.constant dense<0.000000e+00> : vector<8x96xf32>
    %6 = tpu.matmul %3, %5, %cst {dimension_numbers = #tpu.dot_dimension_numbers<[1], [0], [0], [1], [0, 0, 1, 1], [], []>} : vector<8x32xf32>, vector<32x96xf32>, vector<8x96xf32> -> vector<8x96xf32>
    %c0_7 = arith.constant 0 : index
    %c0_8 = arith.constant 0 : index
    %7 = vector.load %arg5[%c0_7, %c0_8] : memref<1x96xf32, #tpu.memory_space<vmem>>, vector<1x96xf32>
    %8 = vector.broadcast %7 : vector<1x96xf32> to vector<8x96xf32>
    %9 = arith.addf %6, %8 : vector<8x96xf32>
    %10 = arith.index_cast %c0_i32_1 : i32 to index
    %c0_9 = arith.constant 0 : index
    %c0_10 = arith.constant 0 : index
    %11 = vector.load %arg2[%10, %c0_9, %c0_10] : memref<8x8x96xf32, #tpu.memory_space<vmem>>, vector<1x8x96xf32>
    %12 = vector.shape_cast %11 : vector<1x8x96xf32> to vector<8x96xf32>
    %13 = vector.extract_strided_slice %12 {offsets = [0, 0], sizes = [8, 32], strides = [1, 1]} : vector<8x96xf32> to vector<8x32xf32>
    %14 = vector.extract_strided_slice %9 {offsets = [0, 0], sizes = [8, 32], strides = [1, 1]} : vector<8x96xf32> to vector<8x32xf32>
    %15 = arith.addf %13, %14 : vector<8x32xf32>
    %16 = arith.negf %15 : vector<8x32xf32>
    %17 = math.exp %16 : vector<8x32xf32>
    %cst_11 = arith.constant 1.000000e+00 : f32
    %18 = vector.broadcast %cst_11 : f32 to vector<8x32xf32>
    %19 = arith.addf %18, %17 : vector<8x32xf32>
    %20 = arith.divf %18, %19 : vector<8x32xf32>
    %21 = vector.extract_strided_slice %12 {offsets = [0, 32], sizes = [8, 32], strides = [1, 1]} : vector<8x96xf32> to vector<8x32xf32>
    %22 = vector.extract_strided_slice %9 {offsets = [0, 32], sizes = [8, 32], strides = [1, 1]} : vector<8x96xf32> to vector<8x32xf32>
    %23 = arith.addf %21, %22 : vector<8x32xf32>
    %24 = arith.negf %23 : vector<8x32xf32>
    %25 = math.exp %24 : vector<8x32xf32>
    %cst_12 = arith.constant 1.000000e+00 : f32
    %26 = vector.broadcast %cst_12 : f32 to vector<8x32xf32>
    %27 = arith.addf %26, %25 : vector<8x32xf32>
    %28 = arith.divf %26, %27 : vector<8x32xf32>
    %29 = vector.extract_strided_slice %12 {offsets = [0, 64], sizes = [8, 32], strides = [1, 1]} : vector<8x96xf32> to vector<8x32xf32>
    %30 = vector.extract_strided_slice %9 {offsets = [0, 64], sizes = [8, 32], strides = [1, 1]} : vector<8x96xf32> to vector<8x32xf32>
    %31 = arith.mulf %20, %30 : vector<8x32xf32>
    %32 = arith.addf %29, %31 : vector<8x32xf32>
    %33 = math.tanh %32 : vector<8x32xf32>
    %cst_13 = arith.constant 1.000000e+00 : f32
    %34 = vector.broadcast %cst_13 : f32 to vector<8x32xf32>
    %35 = arith.subf %34, %28 : vector<8x32xf32>
    %36 = arith.mulf %35, %33 : vector<8x32xf32>
    %37 = arith.mulf %28, %3 : vector<8x32xf32>
    %38 = arith.addf %36, %37 : vector<8x32xf32>
    %c0_14 = arith.constant 0 : index
    %c0_15 = arith.constant 0 : index
    %39 = vector.load %arg6[%c0_14, %c0_15] : memref<32x96xf32, #tpu.memory_space<vmem>>, vector<32x96xf32>
    %cst_16 = arith.constant dense<0.000000e+00> : vector<8x96xf32>
    %40 = tpu.matmul %38, %39, %cst_16 {dimension_numbers = #tpu.dot_dimension_numbers<[1], [0], [0], [1], [0, 0, 1, 1], [], []>} : vector<8x32xf32>, vector<32x96xf32>, vector<8x96xf32> -> vector<8x96xf32>
    %c0_17 = arith.constant 0 : index
    %c0_18 = arith.constant 0 : index
    %41 = vector.load %arg7[%c0_17, %c0_18] : memref<1x96xf32, #tpu.memory_space<vmem>>, vector<1x96xf32>
    %42 = vector.broadcast %41 : vector<1x96xf32> to vector<8x96xf32>
    %43 = arith.addf %40, %42 : vector<8x96xf32>
    %c0_19 = arith.constant 0 : index
    %c0_20 = arith.constant 0 : index
    %44 = vector.load %arg8[%c0_19, %c0_20] : memref<32x96xf32, #tpu.memory_space<vmem>>, vector<32x96xf32>
    %cst_21 = arith.constant dense<0.000000e+00> : vector<8x96xf32>
    %45 = tpu.matmul %4, %44, %cst_21 {dimension_numbers = #tpu.dot_dimension_numbers<[1], [0], [0], [1], [0, 0, 1, 1], [], []>} : vector<8x32xf32>, vector<32x96xf32>, vector<8x96xf32> -> vector<8x96xf32>
    %c0_22 = arith.constant 0 : index
    %c0_23 = arith.constant 0 : index
    %46 = vector.load %arg9[%c0_22, %c0_23] : memref<1x96xf32, #tpu.memory_space<vmem>>, vector<1x96xf32>
    %47 = vector.broadcast %46 : vector<1x96xf32> to vector<8x96xf32>
    %48 = arith.addf %45, %47 : vector<8x96xf32>
    %49 = vector.extract_strided_slice %43 {offsets = [0, 0], sizes = [8, 32], strides = [1, 1]} : vector<8x96xf32> to vector<8x32xf32>
    %50 = vector.extract_strided_slice %48 {offsets = [0, 0], sizes = [8, 32], strides = [1, 1]} : vector<8x96xf32> to vector<8x32xf32>
    %51 = arith.addf %49, %50 : vector<8x32xf32>
    %52 = arith.negf %51 : vector<8x32xf32>
    %53 = math.exp %52 : vector<8x32xf32>
    %cst_24 = arith.constant 1.000000e+00 : f32
    %54 = vector.broadcast %cst_24 : f32 to vector<8x32xf32>
    %55 = arith.addf %54, %53 : vector<8x32xf32>
    %56 = arith.divf %54, %55 : vector<8x32xf32>
    %57 = vector.extract_strided_slice %43 {offsets = [0, 32], sizes = [8, 32], strides = [1, 1]} : vector<8x96xf32> to vector<8x32xf32>
    %58 = vector.extract_strided_slice %48 {offsets = [0, 32], sizes = [8, 32], strides = [1, 1]} : vector<8x96xf32> to vector<8x32xf32>
    %59 = arith.addf %57, %58 : vector<8x32xf32>
    %60 = arith.negf %59 : vector<8x32xf32>
    %61 = math.exp %60 : vector<8x32xf32>
    %cst_25 = arith.constant 1.000000e+00 : f32
    %62 = vector.broadcast %cst_25 : f32 to vector<8x32xf32>
    %63 = arith.addf %62, %61 : vector<8x32xf32>
    %64 = arith.divf %62, %63 : vector<8x32xf32>
    %65 = vector.extract_strided_slice %43 {offsets = [0, 64], sizes = [8, 32], strides = [1, 1]} : vector<8x96xf32> to vector<8x32xf32>
    %66 = vector.extract_strided_slice %48 {offsets = [0, 64], sizes = [8, 32], strides = [1, 1]} : vector<8x96xf32> to vector<8x32xf32>
    %67 = arith.mulf %56, %66 : vector<8x32xf32>
    %68 = arith.addf %65, %67 : vector<8x32xf32>
    %69 = math.tanh %68 : vector<8x32xf32>
    %cst_26 = arith.constant 1.000000e+00 : f32
    %70 = vector.broadcast %cst_26 : f32 to vector<8x32xf32>
    %71 = arith.subf %70, %64 : vector<8x32xf32>
    %72 = arith.mulf %71, %69 : vector<8x32xf32>
    %73 = arith.mulf %64, %4 : vector<8x32xf32>
    %74 = arith.addf %72, %73 : vector<8x32xf32>
    %c0_27 = arith.constant 0 : index
    %c0_28 = arith.constant 0 : index
    %75 = vector.load %arg15[%c0_27, %c0_28] : memref<8x32xf32, #tpu.memory_space<vmem>>, vector<8x32xf32>
    tpu.vector_store %arg15[%c0_27, %c0_28], %38 {strides = array<i32>} : memref<8x32xf32, #tpu.memory_space<vmem>>, vector<8x32xf32>,
    %c0_29 = arith.constant 0 : index
    %c0_30 = arith.constant 0 : index
    %76 = vector.load %arg16[%c0_29, %c0_30] : memref<8x32xf32, #tpu.memory_space<vmem>>, vector<8x32xf32>
    tpu.vector_store %arg16[%c0_29, %c0_30], %74 {strides = array<i32>} : memref<8x32xf32, #tpu.memory_space<vmem>>, vector<8x32xf32>,
    %c1_i32 = arith.constant 1 : i32
    %c0_31 = arith.constant 0 : index
    %c0_32 = arith.constant 0 : index
    %77 = vector.load %arg15[%c0_31, %c0_32] : memref<8x32xf32, #tpu.memory_space<vmem>>, vector<8x32xf32>
    %c0_33 = arith.constant 0 : index
    %c0_34 = arith.constant 0 : index
    %78 = vector.load %arg16[%c0_33, %c0_34] : memref<8x32xf32, #tpu.memory_space<vmem>>, vector<8x32xf32>
    %c0_35 = arith.constant 0 : index
    %c0_36 = arith.constant 0 : index
    %79 = vector.load %arg4[%c0_35, %c0_36] : memref<32x96xf32, #tpu.memory_space<vmem>>, vector<32x96xf32>
    %cst_37 = arith.constant dense<0.000000e+00> : vector<8x96xf32>
    %80 = tpu.matmul %77, %79, %cst_37 {dimension_numbers = #tpu.dot_dimension_numbers<[1], [0], [0], [1], [0, 0, 1, 1], [], []>} : vector<8x32xf32>, vector<32x96xf32>, vector<8x96xf32> -> vector<8x96xf32>
    %c0_38 = arith.constant 0 : index
    %c0_39 = arith.constant 0 : index
    %81 = vector.load %arg5[%c0_38, %c0_39] : memref<1x96xf32, #tpu.memory_space<vmem>>, vector<1x96xf32>
    %82 = vector.broadcast %81 : vector<1x96xf32> to vector<8x96xf32>
    %83 = arith.addf %80, %82 : vector<8x96xf32>
    %84 = arith.index_cast %c1_i32 : i32 to index
    %c0_40 = arith.constant 0 : index
    %c0_41 = arith.constant 0 : index
    %85 = vector.load %arg2[%84, %c0_40, %c0_41] : memref<8x8x96xf32, #tpu.memory_space<vmem>>, vector<1x8x96xf32>
    %86 = vector.shape_cast %85 : vector<1x8x96xf32> to vector<8x96xf32>
    %87 = vector.extract_strided_slice %86 {offsets = [0, 0], sizes = [8, 32], strides = [1, 1]} : vector<8x96xf32> to vector<8x32xf32>
    %88 = vector.extract_strided_slice %83 {offsets = [0, 0], sizes = [8, 32], strides = [1, 1]} : vector<8x96xf32> to vector<8x32xf32>
    %89 = arith.addf %87, %88 : vector<8x32xf32>
    %90 = arith.negf %89 : vector<8x32xf32>
    %91 = math.exp %90 : vector<8x32xf32>
    %cst_42 = arith.constant 1.000000e+00 : f32
    %92 = vector.broadcast %cst_42 : f32 to vector<8x32xf32>
    %93 = arith.addf %92, %91 : vector<8x32xf32>
    %94 = arith.divf %92, %93 : vector<8x32xf32>
    %95 = vector.extract_strided_slice %86 {offsets = [0, 32], sizes = [8, 32], strides = [1, 1]} : vector<8x96xf32> to vector<8x32xf32>
    %96 = vector.extract_strided_slice %83 {offsets = [0, 32], sizes = [8, 32], strides = [1, 1]} : vector<8x96xf32> to vector<8x32xf32>
    %97 = arith.addf %95, %96 : vector<8x32xf32>
    %98 = arith.negf %97 : vector<8x32xf32>
    %99 = math.exp %98 : vector<8x32xf32>
    %cst_43 = arith.constant 1.000000e+00 : f32
    %100 = vector.broadcast %cst_43 : f32 to vector<8x32xf32>
    %101 = arith.addf %100, %99 : vector<8x32xf32>
    %102 = arith.divf %100, %101 : vector<8x32xf32>
    %103 = vector.extract_strided_slice %86 {offsets = [0, 64], sizes = [8, 32], strides = [1, 1]} : vector<8x96xf32> to vector<8x32xf32>
    %104 = vector.extract_strided_slice %83 {offsets = [0, 64], sizes = [8, 32], strides = [1, 1]} : vector<8x96xf32> to vector<8x32xf32>
    %105 = arith.mulf %94, %104 : vector<8x32xf32>
    %106 = arith.addf %103, %105 : vector<8x32xf32>
    %107 = math.tanh %106 : vector<8x32xf32>
    %cst_44 = arith.constant 1.000000e+00 : f32
    %108 = vector.broadcast %cst_44 : f32 to vector<8x32xf32>
    %109 = arith.subf %108, %102 : vector<8x32xf32>
    %110 = arith.mulf %109, %107 : vector<8x32xf32>
    %111 = arith.mulf %102, %77 : vector<8x32xf32>
    %112 = arith.addf %110, %111 : vector<8x32xf32>
    %c0_45 = arith.constant 0 : index
    %c0_46 = arith.constant 0 : index
    %113 = vector.load %arg6[%c0_45, %c0_46] : memref<32x96xf32, #tpu.memory_space<vmem>>, vector<32x96xf32>
    %cst_47 = arith.constant dense<0.000000e+00> : vector<8x96xf32>
    %114 = tpu.matmul %112, %113, %cst_47 {dimension_numbers = #tpu.dot_dimension_numbers<[1], [0], [0], [1], [0, 0, 1, 1], [], []>} : vector<8x32xf32>, vector<32x96xf32>, vector<8x96xf32> -> vector<8x96xf32>
    %c0_48 = arith.constant 0 : index
    %c0_49 = arith.constant 0 : index
    %115 = vector.load %arg7[%c0_48, %c0_49] : memref<1x96xf32, #tpu.memory_space<vmem>>, vector<1x96xf32>
    %116 = vector.broadcast %115 : vector<1x96xf32> to vector<8x96xf32>
    %117 = arith.addf %114, %116 : vector<8x96xf32>
    %c0_50 = arith.constant 0 : index
    %c0_51 = arith.constant 0 : index
    %118 = vector.load %arg8[%c0_50, %c0_51] : memref<32x96xf32, #tpu.memory_space<vmem>>, vector<32x96xf32>
    %cst_52 = arith.constant dense<0.000000e+00> : vector<8x96xf32>
    %119 = tpu.matmul %78, %118, %cst_52 {dimension_numbers = #tpu.dot_dimension_numbers<[1], [0], [0], [1], [0, 0, 1, 1], [], []>} : vector<8x32xf32>, vector<32x96xf32>, vector<8x96xf32> -> vector<8x96xf32>
    %c0_53 = arith.constant 0 : index
    %c0_54 = arith.constant 0 : index
    %120 = vector.load %arg9[%c0_53, %c0_54] : memref<1x96xf32, #tpu.memory_space<vmem>>, vector<1x96xf32>
    %121 = vector.broadcast %120 : vector<1x96xf32> to vector<8x96xf32>
    %122 = arith.addf %119, %121 : vector<8x96xf32>
    %123 = vector.extract_strided_slice %117 {offsets = [0, 0], sizes = [8, 32], strides = [1, 1]} : vector<8x96xf32> to vector<8x32xf32>
    %124 = vector.extract_strided_slice %122 {offsets = [0, 0], sizes = [8, 32], strides = [1, 1]} : vector<8x96xf32> to vector<8x32xf32>
    %125 = arith.addf %123, %124 : vector<8x32xf32>
    %126 = arith.negf %125 : vector<8x32xf32>
    %127 = math.exp %126 : vector<8x32xf32>
    %cst_55 = arith.constant 1.000000e+00 : f32
    %128 = vector.broadcast %cst_55 : f32 to vector<8x32xf32>
    %129 = arith.addf %128, %127 : vector<8x32xf32>
    %130 = arith.divf %128, %129 : vector<8x32xf32>
    %131 = vector.extract_strided_slice %117 {offsets = [0, 32], sizes = [8, 32], strides = [1, 1]} : vector<8x96xf32> to vector<8x32xf32>
    %132 = vector.extract_strided_slice %122 {offsets = [0, 32], sizes = [8, 32], strides = [1, 1]} : vector<8x96xf32> to vector<8x32xf32>
    %133 = arith.addf %131, %132 : vector<8x32xf32>
    %134 = arith.negf %133 : vector<8x32xf32>
    %135 = math.exp %134 : vector<8x32xf32>
    %cst_56 = arith.constant 1.000000e+00 : f32
    %136 = vector.broadcast %cst_56 : f32 to vector<8x32xf32>
    %137 = arith.addf %136, %135 : vector<8x32xf32>
    %138 = arith.divf %136, %137 : vector<8x32xf32>
    %139 = vector.extract_strided_slice %117 {offsets = [0, 64], sizes = [8, 32], strides = [1, 1]} : vector<8x96xf32> to vector<8x32xf32>
    %140 = vector.extract_strided_slice %122 {offsets = [0, 64], sizes = [8, 32], strides = [1, 1]} : vector<8x96xf32> to vector<8x32xf32>
    %141 = arith.mulf %130, %140 : vector<8x32xf32>
    %142 = arith.addf %139, %141 : vector<8x32xf32>
    %143 = math.tanh %142 : vector<8x32xf32>
    %cst_57 = arith.constant 1.000000e+00 : f32
    %144 = vector.broadcast %cst_57 : f32 to vector<8x32xf32>
    %145 = arith.subf %144, %138 : vector<8x32xf32>
    %146 = arith.mulf %145, %143 : vector<8x32xf32>
    %147 = arith.mulf %138, %78 : vector<8x32xf32>
    %148 = arith.addf %146, %147 : vector<8x32xf32>
    %c0_58 = arith.constant 0 : index
    %c0_59 = arith.constant 0 : index
    %149 = vector.load %arg15[%c0_58, %c0_59] : memref<8x32xf32, #tpu.memory_space<vmem>>, vector<8x32xf32>
    tpu.vector_store %arg15[%c0_58, %c0_59], %112 {strides = array<i32>} : memref<8x32xf32, #tpu.memory_space<vmem>>, vector<8x32xf32>,
    %c0_60 = arith.constant 0 : index
    %c0_61 = arith.constant 0 : index
    %150 = vector.load %arg16[%c0_60, %c0_61] : memref<8x32xf32, #tpu.memory_space<vmem>>, vector<8x32xf32>
    tpu.vector_store %arg16[%c0_60, %c0_61], %148 {strides = array<i32>} : memref<8x32xf32, #tpu.memory_space<vmem>>, vector<8x32xf32>,
    %c2_i32 = arith.constant 2 : i32
    %c0_62 = arith.constant 0 : index
    %c0_63 = arith.constant 0 : index
    %151 = vector.load %arg15[%c0_62, %c0_63] : memref<8x32xf32, #tpu.memory_space<vmem>>, vector<8x32xf32>
    %c0_64 = arith.constant 0 : index
    %c0_65 = arith.constant 0 : index
    %152 = vector.load %arg16[%c0_64, %c0_65] : memref<8x32xf32, #tpu.memory_space<vmem>>, vector<8x32xf32>
    %c0_66 = arith.constant 0 : index
    %c0_67 = arith.constant 0 : index
    %153 = vector.load %arg4[%c0_66, %c0_67] : memref<32x96xf32, #tpu.memory_space<vmem>>, vector<32x96xf32>
    %cst_68 = arith.constant dense<0.000000e+00> : vector<8x96xf32>
    %154 = tpu.matmul %151, %153, %cst_68 {dimension_numbers = #tpu.dot_dimension_numbers<[1], [0], [0], [1], [0, 0, 1, 1], [], []>} : vector<8x32xf32>, vector<32x96xf32>, vector<8x96xf32> -> vector<8x96xf32>
    %c0_69 = arith.constant 0 : index
    %c0_70 = arith.constant 0 : index
    %155 = vector.load %arg5[%c0_69, %c0_70] : memref<1x96xf32, #tpu.memory_space<vmem>>, vector<1x96xf32>
    %156 = vector.broadcast %155 : vector<1x96xf32> to vector<8x96xf32>
    %157 = arith.addf %154, %156 : vector<8x96xf32>
    %158 = arith.index_cast %c2_i32 : i32 to index
    %c0_71 = arith.constant 0 : index
    %c0_72 = arith.constant 0 : index
    %159 = vector.load %arg2[%158, %c0_71, %c0_72] : memref<8x8x96xf32, #tpu.memory_space<vmem>>, vector<1x8x96xf32>
    %160 = vector.shape_cast %159 : vector<1x8x96xf32> to vector<8x96xf32>
    %161 = vector.extract_strided_slice %160 {offsets = [0, 0], sizes = [8, 32], strides = [1, 1]} : vector<8x96xf32> to vector<8x32xf32>
    %162 = vector.extract_strided_slice %157 {offsets = [0, 0], sizes = [8, 32], strides = [1, 1]} : vector<8x96xf32> to vector<8x32xf32>
    %163 = arith.addf %161, %162 : vector<8x32xf32>
    %164 = arith.negf %163 : vector<8x32xf32>
    %165 = math.exp %164 : vector<8x32xf32>
    %cst_73 = arith.constant 1.000000e+00 : f32
    %166 = vector.broadcast %cst_73 : f32 to vector<8x32xf32>
    %167 = arith.addf %166, %165 : vector<8x32xf32>
    %168 = arith.divf %166, %167 : vector<8x32xf32>
    %169 = vector.extract_strided_slice %160 {offsets = [0, 32], sizes = [8, 32], strides = [1, 1]} : vector<8x96xf32> to vector<8x32xf32>
    %170 = vector.extract_strided_slice %157 {offsets = [0, 32], sizes = [8, 32], strides = [1, 1]} : vector<8x96xf32> to vector<8x32xf32>
    %171 = arith.addf %169, %170 : vector<8x32xf32>
    %172 = arith.negf %171 : vector<8x32xf32>
    %173 = math.exp %172 : vector<8x32xf32>
    %cst_74 = arith.constant 1.000000e+00 : f32
    %174 = vector.broadcast %cst_74 : f32 to vector<8x32xf32>
    %175 = arith.addf %174, %173 : vector<8x32xf32>
    %176 = arith.divf %174, %175 : vector<8x32xf32>
    %177 = vector.extract_strided_slice %160 {offsets = [0, 64], sizes = [8, 32], strides = [1, 1]} : vector<8x96xf32> to vector<8x32xf32>
    %178 = vector.extract_strided_slice %157 {offsets = [0, 64], sizes = [8, 32], strides = [1, 1]} : vector<8x96xf32> to vector<8x32xf32>
    %179 = arith.mulf %168, %178 : vector<8x32xf32>
    %180 = arith.addf %177, %179 : vector<8x32xf32>
    %181 = math.tanh %180 : vector<8x32xf32>
    %cst_75 = arith.constant 1.000000e+00 : f32
    %182 = vector.broadcast %cst_75 : f32 to vector<8x32xf32>
    %183 = arith.subf %182, %176 : vector<8x32xf32>
    %184 = arith.mulf %183, %181 : vector<8x32xf32>
    %185 = arith.mulf %176, %151 : vector<8x32xf32>
    %186 = arith.addf %184, %185 : vector<8x32xf32>
    %c0_76 = arith.constant 0 : index
    %c0_77 = arith.constant 0 : index
    %187 = vector.load %arg6[%c0_76, %c0_77] : memref<32x96xf32, #tpu.memory_space<vmem>>, vector<32x96xf32>
    %cst_78 = arith.constant dense<0.000000e+00> : vector<8x96xf32>
    %188 = tpu.matmul %186, %187, %cst_78 {dimension_numbers = #tpu.dot_dimension_numbers<[1], [0], [0], [1], [0, 0, 1, 1], [], []>} : vector<8x32xf32>, vector<32x96xf32>, vector<8x96xf32> -> vector<8x96xf32>
    %c0_79 = arith.constant 0 : index
    %c0_80 = arith.constant 0 : index
    %189 = vector.load %arg7[%c0_79, %c0_80] : memref<1x96xf32, #tpu.memory_space<vmem>>, vector<1x96xf32>
    %190 = vector.broadcast %189 : vector<1x96xf32> to vector<8x96xf32>
    %191 = arith.addf %188, %190 : vector<8x96xf32>
    %c0_81 = arith.constant 0 : index
    %c0_82 = arith.constant 0 : index
    %192 = vector.load %arg8[%c0_81, %c0_82] : memref<32x96xf32, #tpu.memory_space<vmem>>, vector<32x96xf32>
    %cst_83 = arith.constant dense<0.000000e+00> : vector<8x96xf32>
    %193 = tpu.matmul %152, %192, %cst_83 {dimension_numbers = #tpu.dot_dimension_numbers<[1], [0], [0], [1], [0, 0, 1, 1], [], []>} : vector<8x32xf32>, vector<32x96xf32>, vector<8x96xf32> -> vector<8x96xf32>
    %c0_84 = arith.constant 0 : index
    %c0_85 = arith.constant 0 : index
    %194 = vector.load %arg9[%c0_84, %c0_85] : memref<1x96xf32, #tpu.memory_space<vmem>>, vector<1x96xf32>
    %195 = vector.broadcast %194 : vector<1x96xf32> to vector<8x96xf32>
    %196 = arith.addf %193, %195 : vector<8x96xf32>
    %197 = vector.extract_strided_slice %191 {offsets = [0, 0], sizes = [8, 32], strides = [1, 1]} : vector<8x96xf32> to vector<8x32xf32>
    %198 = vector.extract_strided_slice %196 {offsets = [0, 0], sizes = [8, 32], strides = [1, 1]} : vector<8x96xf32> to vector<8x32xf32>
    %199 = arith.addf %197, %198 : vector<8x32xf32>
    %200 = arith.negf %199 : vector<8x32xf32>
    %201 = math.exp %200 : vector<8x32xf32>
    %cst_86 = arith.constant 1.000000e+00 : f32
    %202 = vector.broadcast %cst_86 : f32 to vector<8x32xf32>
    %203 = arith.addf %202, %201 : vector<8x32xf32>
    %204 = arith.divf %202, %203 : vector<8x32xf32>
    %205 = vector.extract_strided_slice %191 {offsets = [0, 32], sizes = [8, 32], strides = [1, 1]} : vector<8x96xf32> to vector<8x32xf32>
    %206 = vector.extract_strided_slice %196 {offsets = [0, 32], sizes = [8, 32], strides = [1, 1]} : vector<8x96xf32> to vector<8x32xf32>
    %207 = arith.addf %205, %206 : vector<8x32xf32>
    %208 = arith.negf %207 : vector<8x32xf32>
    %209 = math.exp %208 : vector<8x32xf32>
    %cst_87 = arith.constant 1.000000e+00 : f32
    %210 = vector.broadcast %cst_87 : f32 to vector<8x32xf32>
    %211 = arith.addf %210, %209 : vector<8x32xf32>
    %212 = arith.divf %210, %211 : vector<8x32xf32>
    %213 = vector.extract_strided_slice %191 {offsets = [0, 64], sizes = [8, 32], strides = [1, 1]} : vector<8x96xf32> to vector<8x32xf32>
    %214 = vector.extract_strided_slice %196 {offsets = [0, 64], sizes = [8, 32], strides = [1, 1]} : vector<8x96xf32> to vector<8x32xf32>
    %215 = arith.mulf %204, %214 : vector<8x32xf32>
    %216 = arith.addf %213, %215 : vector<8x32xf32>
    %217 = math.tanh %216 : vector<8x32xf32>
    %cst_88 = arith.constant 1.000000e+00 : f32
    %218 = vector.broadcast %cst_88 : f32 to vector<8x32xf32>
    %219 = arith.subf %218, %212 : vector<8x32xf32>
    %220 = arith.mulf %219, %217 : vector<8x32xf32>
    %221 = arith.mulf %212, %152 : vector<8x32xf32>
    %222 = arith.addf %220, %221 : vector<8x32xf32>
    %c0_89 = arith.constant 0 : index
    %c0_90 = arith.constant 0 : index
    %223 = vector.load %arg15[%c0_89, %c0_90] : memref<8x32xf32, #tpu.memory_space<vmem>>, vector<8x32xf32>
    tpu.vector_store %arg15[%c0_89, %c0_90], %186 {strides = array<i32>} : memref<8x32xf32, #tpu.memory_space<vmem>>, vector<8x32xf32>,
    %c0_91 = arith.constant 0 : index
    %c0_92 = arith.constant 0 : index
    %224 = vector.load %arg16[%c0_91, %c0_92] : memref<8x32xf32, #tpu.memory_space<vmem>>, vector<8x32xf32>
    tpu.vector_store %arg16[%c0_91, %c0_92], %222 {strides = array<i32>} : memref<8x32xf32, #tpu.memory_space<vmem>>, vector<8x32xf32>,
    %c3_i32 = arith.constant 3 : i32
    %c0_93 = arith.constant 0 : index
    %c0_94 = arith.constant 0 : index
    %225 = vector.load %arg15[%c0_93, %c0_94] : memref<8x32xf32, #tpu.memory_space<vmem>>, vector<8x32xf32>
    %c0_95 = arith.constant 0 : index
    %c0_96 = arith.constant 0 : index
    %226 = vector.load %arg16[%c0_95, %c0_96] : memref<8x32xf32, #tpu.memory_space<vmem>>, vector<8x32xf32>
    %c0_97 = arith.constant 0 : index
    %c0_98 = arith.constant 0 : index
    %227 = vector.load %arg4[%c0_97, %c0_98] : memref<32x96xf32, #tpu.memory_space<vmem>>, vector<32x96xf32>
    %cst_99 = arith.constant dense<0.000000e+00> : vector<8x96xf32>
    %228 = tpu.matmul %225, %227, %cst_99 {dimension_numbers = #tpu.dot_dimension_numbers<[1], [0], [0], [1], [0, 0, 1, 1], [], []>} : vector<8x32xf32>, vector<32x96xf32>, vector<8x96xf32> -> vector<8x96xf32>
    %c0_100 = arith.constant 0 : index
    %c0_101 = arith.constant 0 : index
    %229 = vector.load %arg5[%c0_100, %c0_101] : memref<1x96xf32, #tpu.memory_space<vmem>>, vector<1x96xf32>
    %230 = vector.broadcast %229 : vector<1x96xf32> to vector<8x96xf32>
    %231 = arith.addf %228, %230 : vector<8x96xf32>
    %232 = arith.index_cast %c3_i32 : i32 to index
    %c0_102 = arith.constant 0 : index
    %c0_103 = arith.constant 0 : index
    %233 = vector.load %arg2[%232, %c0_102, %c0_103] : memref<8x8x96xf32, #tpu.memory_space<vmem>>, vector<1x8x96xf32>
    %234 = vector.shape_cast %233 : vector<1x8x96xf32> to vector<8x96xf32>
    %235 = vector.extract_strided_slice %234 {offsets = [0, 0], sizes = [8, 32], strides = [1, 1]} : vector<8x96xf32> to vector<8x32xf32>
    %236 = vector.extract_strided_slice %231 {offsets = [0, 0], sizes = [8, 32], strides = [1, 1]} : vector<8x96xf32> to vector<8x32xf32>
    %237 = arith.addf %235, %236 : vector<8x32xf32>
    %238 = arith.negf %237 : vector<8x32xf32>
    %239 = math.exp %238 : vector<8x32xf32>
    %cst_104 = arith.constant 1.000000e+00 : f32
    %240 = vector.broadcast %cst_104 : f32 to vector<8x32xf32>
    %241 = arith.addf %240, %239 : vector<8x32xf32>
    %242 = arith.divf %240, %241 : vector<8x32xf32>
    %243 = vector.extract_strided_slice %234 {offsets = [0, 32], sizes = [8, 32], strides = [1, 1]} : vector<8x96xf32> to vector<8x32xf32>
    %244 = vector.extract_strided_slice %231 {offsets = [0, 32], sizes = [8, 32], strides = [1, 1]} : vector<8x96xf32> to vector<8x32xf32>
    %245 = arith.addf %243, %244 : vector<8x32xf32>
    %246 = arith.negf %245 : vector<8x32xf32>
    %247 = math.exp %246 : vector<8x32xf32>
    %cst_105 = arith.constant 1.000000e+00 : f32
    %248 = vector.broadcast %cst_105 : f32 to vector<8x32xf32>
    %249 = arith.addf %248, %247 : vector<8x32xf32>
    %250 = arith.divf %248, %249 : vector<8x32xf32>
    %251 = vector.extract_strided_slice %234 {offsets = [0, 64], sizes = [8, 32], strides = [1, 1]} : vector<8x96xf32> to vector<8x32xf32>
    %252 = vector.extract_strided_slice %231 {offsets = [0, 64], sizes = [8, 32], strides = [1, 1]} : vector<8x96xf32> to vector<8x32xf32>
    %253 = arith.mulf %242, %252 : vector<8x32xf32>
    %254 = arith.addf %251, %253 : vector<8x32xf32>
    %255 = math.tanh %254 : vector<8x32xf32>
    %cst_106 = arith.constant 1.000000e+00 : f32
    %256 = vector.broadcast %cst_106 : f32 to vector<8x32xf32>
    %257 = arith.subf %256, %250 : vector<8x32xf32>
    %258 = arith.mulf %257, %255 : vector<8x32xf32>
    %259 = arith.mulf %250, %225 : vector<8x32xf32>
    %260 = arith.addf %258, %259 : vector<8x32xf32>
    %c0_107 = arith.constant 0 : index
    %c0_108 = arith.constant 0 : index
    %261 = vector.load %arg6[%c0_107, %c0_108] : memref<32x96xf32, #tpu.memory_space<vmem>>, vector<32x96xf32>
    %cst_109 = arith.constant dense<0.000000e+00> : vector<8x96xf32>
    %262 = tpu.matmul %260, %261, %cst_109 {dimension_numbers = #tpu.dot_dimension_numbers<[1], [0], [0], [1], [0, 0, 1, 1], [], []>} : vector<8x32xf32>, vector<32x96xf32>, vector<8x96xf32> -> vector<8x96xf32>
    %c0_110 = arith.constant 0 : index
    %c0_111 = arith.constant 0 : index
    %263 = vector.load %arg7[%c0_110, %c0_111] : memref<1x96xf32, #tpu.memory_space<vmem>>, vector<1x96xf32>
    %264 = vector.broadcast %263 : vector<1x96xf32> to vector<8x96xf32>
    %265 = arith.addf %262, %264 : vector<8x96xf32>
    %c0_112 = arith.constant 0 : index
    %c0_113 = arith.constant 0 : index
    %266 = vector.load %arg8[%c0_112, %c0_113] : memref<32x96xf32, #tpu.memory_space<vmem>>, vector<32x96xf32>
    %cst_114 = arith.constant dense<0.000000e+00> : vector<8x96xf32>
    %267 = tpu.matmul %226, %266, %cst_114 {dimension_numbers = #tpu.dot_dimension_numbers<[1], [0], [0], [1], [0, 0, 1, 1], [], []>} : vector<8x32xf32>, vector<32x96xf32>, vector<8x96xf32> -> vector<8x96xf32>
    %c0_115 = arith.constant 0 : index
    %c0_116 = arith.constant 0 : index
    %268 = vector.load %arg9[%c0_115, %c0_116] : memref<1x96xf32, #tpu.memory_space<vmem>>, vector<1x96xf32>
    %269 = vector.broadcast %268 : vector<1x96xf32> to vector<8x96xf32>
    %270 = arith.addf %267, %269 : vector<8x96xf32>
    %271 = vector.extract_strided_slice %265 {offsets = [0, 0], sizes = [8, 32], strides = [1, 1]} : vector<8x96xf32> to vector<8x32xf32>
    %272 = vector.extract_strided_slice %270 {offsets = [0, 0], sizes = [8, 32], strides = [1, 1]} : vector<8x96xf32> to vector<8x32xf32>
    %273 = arith.addf %271, %272 : vector<8x32xf32>
    %274 = arith.negf %273 : vector<8x32xf32>
    %275 = math.exp %274 : vector<8x32xf32>
    %cst_117 = arith.constant 1.000000e+00 : f32
    %276 = vector.broadcast %cst_117 : f32 to vector<8x32xf32>
    %277 = arith.addf %276, %275 : vector<8x32xf32>
    %278 = arith.divf %276, %277 : vector<8x32xf32>
    %279 = vector.extract_strided_slice %265 {offsets = [0, 32], sizes = [8, 32], strides = [1, 1]} : vector<8x96xf32> to vector<8x32xf32>
    %280 = vector.extract_strided_slice %270 {offsets = [0, 32], sizes = [8, 32], strides = [1, 1]} : vector<8x96xf32> to vector<8x32xf32>
    %281 = arith.addf %279, %280 : vector<8x32xf32>
    %282 = arith.negf %281 : vector<8x32xf32>
    %283 = math.exp %282 : vector<8x32xf32>
    %cst_118 = arith.constant 1.000000e+00 : f32
    %284 = vector.broadcast %cst_118 : f32 to vector<8x32xf32>
    %285 = arith.addf %284, %283 : vector<8x32xf32>
    %286 = arith.divf %284, %285 : vector<8x32xf32>
    %287 = vector.extract_strided_slice %265 {offsets = [0, 64], sizes = [8, 32], strides = [1, 1]} : vector<8x96xf32> to vector<8x32xf32>
    %288 = vector.extract_strided_slice %270 {offsets = [0, 64], sizes = [8, 32], strides = [1, 1]} : vector<8x96xf32> to vector<8x32xf32>
    %289 = arith.mulf %278, %288 : vector<8x32xf32>
    %290 = arith.addf %287, %289 : vector<8x32xf32>
    %291 = math.tanh %290 : vector<8x32xf32>
    %cst_119 = arith.constant 1.000000e+00 : f32
    %292 = vector.broadcast %cst_119 : f32 to vector<8x32xf32>
    %293 = arith.subf %292, %286 : vector<8x32xf32>
    %294 = arith.mulf %293, %291 : vector<8x32xf32>
    %295 = arith.mulf %286, %226 : vector<8x32xf32>
    %296 = arith.addf %294, %295 : vector<8x32xf32>
    %c0_120 = arith.constant 0 : index
    %c0_121 = arith.constant 0 : index
    %297 = vector.load %arg15[%c0_120, %c0_121] : memref<8x32xf32, #tpu.memory_space<vmem>>, vector<8x32xf32>
    tpu.vector_store %arg15[%c0_120, %c0_121], %260 {strides = array<i32>} : memref<8x32xf32, #tpu.memory_space<vmem>>, vector<8x32xf32>,
    %c0_122 = arith.constant 0 : index
    %c0_123 = arith.constant 0 : index
    %298 = vector.load %arg16[%c0_122, %c0_123] : memref<8x32xf32, #tpu.memory_space<vmem>>, vector<8x32xf32>
    tpu.vector_store %arg16[%c0_122, %c0_123], %296 {strides = array<i32>} : memref<8x32xf32, #tpu.memory_space<vmem>>, vector<8x32xf32>,
    %c4_i32 = arith.constant 4 : i32
    %c0_124 = arith.constant 0 : index
    %c0_125 = arith.constant 0 : index
    %299 = vector.load %arg15[%c0_124, %c0_125] : memref<8x32xf32, #tpu.memory_space<vmem>>, vector<8x32xf32>
    %c0_126 = arith.constant 0 : index
    %c0_127 = arith.constant 0 : index
    %300 = vector.load %arg16[%c0_126, %c0_127] : memref<8x32xf32, #tpu.memory_space<vmem>>, vector<8x32xf32>
    %c0_128 = arith.constant 0 : index
    %c0_129 = arith.constant 0 : index
    %301 = vector.load %arg4[%c0_128, %c0_129] : memref<32x96xf32, #tpu.memory_space<vmem>>, vector<32x96xf32>
    %cst_130 = arith.constant dense<0.000000e+00> : vector<8x96xf32>
    %302 = tpu.matmul %299, %301, %cst_130 {dimension_numbers = #tpu.dot_dimension_numbers<[1], [0], [0], [1], [0, 0, 1, 1], [], []>} : vector<8x32xf32>, vector<32x96xf32>, vector<8x96xf32> -> vector<8x96xf32>
    %c0_131 = arith.constant 0 : index
    %c0_132 = arith.constant 0 : index
    %303 = vector.load %arg5[%c0_131, %c0_132] : memref<1x96xf32, #tpu.memory_space<vmem>>, vector<1x96xf32>
    %304 = vector.broadcast %303 : vector<1x96xf32> to vector<8x96xf32>
    %305 = arith.addf %302, %304 : vector<8x96xf32>
    %306 = arith.index_cast %c4_i32 : i32 to index
    %c0_133 = arith.constant 0 : index
    %c0_134 = arith.constant 0 : index
    %307 = vector.load %arg2[%306, %c0_133, %c0_134] : memref<8x8x96xf32, #tpu.memory_space<vmem>>, vector<1x8x96xf32>
    %308 = vector.shape_cast %307 : vector<1x8x96xf32> to vector<8x96xf32>
    %309 = vector.extract_strided_slice %308 {offsets = [0, 0], sizes = [8, 32], strides = [1, 1]} : vector<8x96xf32> to vector<8x32xf32>
    %310 = vector.extract_strided_slice %305 {offsets = [0, 0], sizes = [8, 32], strides = [1, 1]} : vector<8x96xf32> to vector<8x32xf32>
    %311 = arith.addf %309, %310 : vector<8x32xf32>
    %312 = arith.negf %311 : vector<8x32xf32>
    %313 = math.exp %312 : vector<8x32xf32>
    %cst_135 = arith.constant 1.000000e+00 : f32
    %314 = vector.broadcast %cst_135 : f32 to vector<8x32xf32>
    %315 = arith.addf %314, %313 : vector<8x32xf32>
    %316 = arith.divf %314, %315 : vector<8x32xf32>
    %317 = vector.extract_strided_slice %308 {offsets = [0, 32], sizes = [8, 32], strides = [1, 1]} : vector<8x96xf32> to vector<8x32xf32>
    %318 = vector.extract_strided_slice %305 {offsets = [0, 32], sizes = [8, 32], strides = [1, 1]} : vector<8x96xf32> to vector<8x32xf32>
    %319 = arith.addf %317, %318 : vector<8x32xf32>
    %320 = arith.negf %319 : vector<8x32xf32>
    %321 = math.exp %320 : vector<8x32xf32>
    %cst_136 = arith.constant 1.000000e+00 : f32
    %322 = vector.broadcast %cst_136 : f32 to vector<8x32xf32>
    %323 = arith.addf %322, %321 : vector<8x32xf32>
    %324 = arith.divf %322, %323 : vector<8x32xf32>
    %325 = vector.extract_strided_slice %308 {offsets = [0, 64], sizes = [8, 32], strides = [1, 1]} : vector<8x96xf32> to vector<8x32xf32>
    %326 = vector.extract_strided_slice %305 {offsets = [0, 64], sizes = [8, 32], strides = [1, 1]} : vector<8x96xf32> to vector<8x32xf32>
    %327 = arith.mulf %316, %326 : vector<8x32xf32>
    %328 = arith.addf %325, %327 : vector<8x32xf32>
    %329 = math.tanh %328 : vector<8x32xf32>
    %cst_137 = arith.constant 1.000000e+00 : f32
    %330 = vector.broadcast %cst_137 : f32 to vector<8x32xf32>
    %331 = arith.subf %330, %324 : vector<8x32xf32>
    %332 = arith.mulf %331, %329 : vector<8x32xf32>
    %333 = arith.mulf %324, %299 : vector<8x32xf32>
    %334 = arith.addf %332, %333 : vector<8x32xf32>
    %c0_138 = arith.constant 0 : index
    %c0_139 = arith.constant 0 : index
    %335 = vector.load %arg6[%c0_138, %c0_139] : memref<32x96xf32, #tpu.memory_space<vmem>>, vector<32x96xf32>
    %cst_140 = arith.constant dense<0.000000e+00> : vector<8x96xf32>
    %336 = tpu.matmul %334, %335, %cst_140 {dimension_numbers = #tpu.dot_dimension_numbers<[1], [0], [0], [1], [0, 0, 1, 1], [], []>} : vector<8x32xf32>, vector<32x96xf32>, vector<8x96xf32> -> vector<8x96xf32>
    %c0_141 = arith.constant 0 : index
    %c0_142 = arith.constant 0 : index
    %337 = vector.load %arg7[%c0_141, %c0_142] : memref<1x96xf32, #tpu.memory_space<vmem>>, vector<1x96xf32>
    %338 = vector.broadcast %337 : vector<1x96xf32> to vector<8x96xf32>
    %339 = arith.addf %336, %338 : vector<8x96xf32>
    %c0_143 = arith.constant 0 : index
    %c0_144 = arith.constant 0 : index
    %340 = vector.load %arg8[%c0_143, %c0_144] : memref<32x96xf32, #tpu.memory_space<vmem>>, vector<32x96xf32>
    %cst_145 = arith.constant dense<0.000000e+00> : vector<8x96xf32>
    %341 = tpu.matmul %300, %340, %cst_145 {dimension_numbers = #tpu.dot_dimension_numbers<[1], [0], [0], [1], [0, 0, 1, 1], [], []>} : vector<8x32xf32>, vector<32x96xf32>, vector<8x96xf32> -> vector<8x96xf32>
    %c0_146 = arith.constant 0 : index
    %c0_147 = arith.constant 0 : index
    %342 = vector.load %arg9[%c0_146, %c0_147] : memref<1x96xf32, #tpu.memory_space<vmem>>, vector<1x96xf32>
    %343 = vector.broadcast %342 : vector<1x96xf32> to vector<8x96xf32>
    %344 = arith.addf %341, %343 : vector<8x96xf32>
    %345 = vector.extract_strided_slice %339 {offsets = [0, 0], sizes = [8, 32], strides = [1, 1]} : vector<8x96xf32> to vector<8x32xf32>
    %346 = vector.extract_strided_slice %344 {offsets = [0, 0], sizes = [8, 32], strides = [1, 1]} : vector<8x96xf32> to vector<8x32xf32>
    %347 = arith.addf %345, %346 : vector<8x32xf32>
    %348 = arith.negf %347 : vector<8x32xf32>
    %349 = math.exp %348 : vector<8x32xf32>
    %cst_148 = arith.constant 1.000000e+00 : f32
    %350 = vector.broadcast %cst_148 : f32 to vector<8x32xf32>
    %351 = arith.addf %350, %349 : vector<8x32xf32>
    %352 = arith.divf %350, %351 : vector<8x32xf32>
    %353 = vector.extract_strided_slice %339 {offsets = [0, 32], sizes = [8, 32], strides = [1, 1]} : vector<8x96xf32> to vector<8x32xf32>
    %354 = vector.extract_strided_slice %344 {offsets = [0, 32], sizes = [8, 32], strides = [1, 1]} : vector<8x96xf32> to vector<8x32xf32>
    %355 = arith.addf %353, %354 : vector<8x32xf32>
    %356 = arith.negf %355 : vector<8x32xf32>
    %357 = math.exp %356 : vector<8x32xf32>
    %cst_149 = arith.constant 1.000000e+00 : f32
    %358 = vector.broadcast %cst_149 : f32 to vector<8x32xf32>
    %359 = arith.addf %358, %357 : vector<8x32xf32>
    %360 = arith.divf %358, %359 : vector<8x32xf32>
    %361 = vector.extract_strided_slice %339 {offsets = [0, 64], sizes = [8, 32], strides = [1, 1]} : vector<8x96xf32> to vector<8x32xf32>
    %362 = vector.extract_strided_slice %344 {offsets = [0, 64], sizes = [8, 32], strides = [1, 1]} : vector<8x96xf32> to vector<8x32xf32>
    %363 = arith.mulf %352, %362 : vector<8x32xf32>
    %364 = arith.addf %361, %363 : vector<8x32xf32>
    %365 = math.tanh %364 : vector<8x32xf32>
    %cst_150 = arith.constant 1.000000e+00 : f32
    %366 = vector.broadcast %cst_150 : f32 to vector<8x32xf32>
    %367 = arith.subf %366, %360 : vector<8x32xf32>
    %368 = arith.mulf %367, %365 : vector<8x32xf32>
    %369 = arith.mulf %360, %300 : vector<8x32xf32>
    %370 = arith.addf %368, %369 : vector<8x32xf32>
    %c0_151 = arith.constant 0 : index
    %c0_152 = arith.constant 0 : index
    %371 = vector.load %arg15[%c0_151, %c0_152] : memref<8x32xf32, #tpu.memory_space<vmem>>, vector<8x32xf32>
    tpu.vector_store %arg15[%c0_151, %c0_152], %334 {strides = array<i32>} : memref<8x32xf32, #tpu.memory_space<vmem>>, vector<8x32xf32>,
    %c0_153 = arith.constant 0 : index
    %c0_154 = arith.constant 0 : index
    %372 = vector.load %arg16[%c0_153, %c0_154] : memref<8x32xf32, #tpu.memory_space<vmem>>, vector<8x32xf32>
    tpu.vector_store %arg16[%c0_153, %c0_154], %370 {strides = array<i32>} : memref<8x32xf32, #tpu.memory_space<vmem>>, vector<8x32xf32>,
    %c5_i32 = arith.constant 5 : i32
    %c0_155 = arith.constant 0 : index
    %c0_156 = arith.constant 0 : index
    %373 = vector.load %arg15[%c0_155, %c0_156] : memref<8x32xf32, #tpu.memory_space<vmem>>, vector<8x32xf32>
    %c0_157 = arith.constant 0 : index
    %c0_158 = arith.constant 0 : index
    %374 = vector.load %arg16[%c0_157, %c0_158] : memref<8x32xf32, #tpu.memory_space<vmem>>, vector<8x32xf32>
    %c0_159 = arith.constant 0 : index
    %c0_160 = arith.constant 0 : index
    %375 = vector.load %arg4[%c0_159, %c0_160] : memref<32x96xf32, #tpu.memory_space<vmem>>, vector<32x96xf32>
    %cst_161 = arith.constant dense<0.000000e+00> : vector<8x96xf32>
    %376 = tpu.matmul %373, %375, %cst_161 {dimension_numbers = #tpu.dot_dimension_numbers<[1], [0], [0], [1], [0, 0, 1, 1], [], []>} : vector<8x32xf32>, vector<32x96xf32>, vector<8x96xf32> -> vector<8x96xf32>
    %c0_162 = arith.constant 0 : index
    %c0_163 = arith.constant 0 : index
    %377 = vector.load %arg5[%c0_162, %c0_163] : memref<1x96xf32, #tpu.memory_space<vmem>>, vector<1x96xf32>
    %378 = vector.broadcast %377 : vector<1x96xf32> to vector<8x96xf32>
    %379 = arith.addf %376, %378 : vector<8x96xf32>
    %380 = arith.index_cast %c5_i32 : i32 to index
    %c0_164 = arith.constant 0 : index
    %c0_165 = arith.constant 0 : index
    %381 = vector.load %arg2[%380, %c0_164, %c0_165] : memref<8x8x96xf32, #tpu.memory_space<vmem>>, vector<1x8x96xf32>
    %382 = vector.shape_cast %381 : vector<1x8x96xf32> to vector<8x96xf32>
    %383 = vector.extract_strided_slice %382 {offsets = [0, 0], sizes = [8, 32], strides = [1, 1]} : vector<8x96xf32> to vector<8x32xf32>
    %384 = vector.extract_strided_slice %379 {offsets = [0, 0], sizes = [8, 32], strides = [1, 1]} : vector<8x96xf32> to vector<8x32xf32>
    %385 = arith.addf %383, %384 : vector<8x32xf32>
    %386 = arith.negf %385 : vector<8x32xf32>
    %387 = math.exp %386 : vector<8x32xf32>
    %cst_166 = arith.constant 1.000000e+00 : f32
    %388 = vector.broadcast %cst_166 : f32 to vector<8x32xf32>
    %389 = arith.addf %388, %387 : vector<8x32xf32>
    %390 = arith.divf %388, %389 : vector<8x32xf32>
    %391 = vector.extract_strided_slice %382 {offsets = [0, 32], sizes = [8, 32], strides = [1, 1]} : vector<8x96xf32> to vector<8x32xf32>
    %392 = vector.extract_strided_slice %379 {offsets = [0, 32], sizes = [8, 32], strides = [1, 1]} : vector<8x96xf32> to vector<8x32xf32>
    %393 = arith.addf %391, %392 : vector<8x32xf32>
    %394 = arith.negf %393 : vector<8x32xf32>
    %395 = math.exp %394 : vector<8x32xf32>
    %cst_167 = arith.constant 1.000000e+00 : f32
    %396 = vector.broadcast %cst_167 : f32 to vector<8x32xf32>
    %397 = arith.addf %396, %395 : vector<8x32xf32>
    %398 = arith.divf %396, %397 : vector<8x32xf32>
    %399 = vector.extract_strided_slice %382 {offsets = [0, 64], sizes = [8, 32], strides = [1, 1]} : vector<8x96xf32> to vector<8x32xf32>
    %400 = vector.extract_strided_slice %379 {offsets = [0, 64], sizes = [8, 32], strides = [1, 1]} : vector<8x96xf32> to vector<8x32xf32>
    %401 = arith.mulf %390, %400 : vector<8x32xf32>
    %402 = arith.addf %399, %401 : vector<8x32xf32>
    %403 = math.tanh %402 : vector<8x32xf32>
    %cst_168 = arith.constant 1.000000e+00 : f32
    %404 = vector.broadcast %cst_168 : f32 to vector<8x32xf32>
    %405 = arith.subf %404, %398 : vector<8x32xf32>
    %406 = arith.mulf %405, %403 : vector<8x32xf32>
    %407 = arith.mulf %398, %373 : vector<8x32xf32>
    %408 = arith.addf %406, %407 : vector<8x32xf32>
    %c0_169 = arith.constant 0 : index
    %c0_170 = arith.constant 0 : index
    %409 = vector.load %arg6[%c0_169, %c0_170] : memref<32x96xf32, #tpu.memory_space<vmem>>, vector<32x96xf32>
    %cst_171 = arith.constant dense<0.000000e+00> : vector<8x96xf32>
    %410 = tpu.matmul %408, %409, %cst_171 {dimension_numbers = #tpu.dot_dimension_numbers<[1], [0], [0], [1], [0, 0, 1, 1], [], []>} : vector<8x32xf32>, vector<32x96xf32>, vector<8x96xf32> -> vector<8x96xf32>
    %c0_172 = arith.constant 0 : index
    %c0_173 = arith.constant 0 : index
    %411 = vector.load %arg7[%c0_172, %c0_173] : memref<1x96xf32, #tpu.memory_space<vmem>>, vector<1x96xf32>
    %412 = vector.broadcast %411 : vector<1x96xf32> to vector<8x96xf32>
    %413 = arith.addf %410, %412 : vector<8x96xf32>
    %c0_174 = arith.constant 0 : index
    %c0_175 = arith.constant 0 : index
    %414 = vector.load %arg8[%c0_174, %c0_175] : memref<32x96xf32, #tpu.memory_space<vmem>>, vector<32x96xf32>
    %cst_176 = arith.constant dense<0.000000e+00> : vector<8x96xf32>
    %415 = tpu.matmul %374, %414, %cst_176 {dimension_numbers = #tpu.dot_dimension_numbers<[1], [0], [0], [1], [0, 0, 1, 1], [], []>} : vector<8x32xf32>, vector<32x96xf32>, vector<8x96xf32> -> vector<8x96xf32>
    %c0_177 = arith.constant 0 : index
    %c0_178 = arith.constant 0 : index
    %416 = vector.load %arg9[%c0_177, %c0_178] : memref<1x96xf32, #tpu.memory_space<vmem>>, vector<1x96xf32>
    %417 = vector.broadcast %416 : vector<1x96xf32> to vector<8x96xf32>
    %418 = arith.addf %415, %417 : vector<8x96xf32>
    %419 = vector.extract_strided_slice %413 {offsets = [0, 0], sizes = [8, 32], strides = [1, 1]} : vector<8x96xf32> to vector<8x32xf32>
    %420 = vector.extract_strided_slice %418 {offsets = [0, 0], sizes = [8, 32], strides = [1, 1]} : vector<8x96xf32> to vector<8x32xf32>
    %421 = arith.addf %419, %420 : vector<8x32xf32>
    %422 = arith.negf %421 : vector<8x32xf32>
    %423 = math.exp %422 : vector<8x32xf32>
    %cst_179 = arith.constant 1.000000e+00 : f32
    %424 = vector.broadcast %cst_179 : f32 to vector<8x32xf32>
    %425 = arith.addf %424, %423 : vector<8x32xf32>
    %426 = arith.divf %424, %425 : vector<8x32xf32>
    %427 = vector.extract_strided_slice %413 {offsets = [0, 32], sizes = [8, 32], strides = [1, 1]} : vector<8x96xf32> to vector<8x32xf32>
    %428 = vector.extract_strided_slice %418 {offsets = [0, 32], sizes = [8, 32], strides = [1, 1]} : vector<8x96xf32> to vector<8x32xf32>
    %429 = arith.addf %427, %428 : vector<8x32xf32>
    %430 = arith.negf %429 : vector<8x32xf32>
    %431 = math.exp %430 : vector<8x32xf32>
    %cst_180 = arith.constant 1.000000e+00 : f32
    %432 = vector.broadcast %cst_180 : f32 to vector<8x32xf32>
    %433 = arith.addf %432, %431 : vector<8x32xf32>
    %434 = arith.divf %432, %433 : vector<8x32xf32>
    %435 = vector.extract_strided_slice %413 {offsets = [0, 64], sizes = [8, 32], strides = [1, 1]} : vector<8x96xf32> to vector<8x32xf32>
    %436 = vector.extract_strided_slice %418 {offsets = [0, 64], sizes = [8, 32], strides = [1, 1]} : vector<8x96xf32> to vector<8x32xf32>
    %437 = arith.mulf %426, %436 : vector<8x32xf32>
    %438 = arith.addf %435, %437 : vector<8x32xf32>
    %439 = math.tanh %438 : vector<8x32xf32>
    %cst_181 = arith.constant 1.000000e+00 : f32
    %440 = vector.broadcast %cst_181 : f32 to vector<8x32xf32>
    %441 = arith.subf %440, %434 : vector<8x32xf32>
    %442 = arith.mulf %441, %439 : vector<8x32xf32>
    %443 = arith.mulf %434, %374 : vector<8x32xf32>
    %444 = arith.addf %442, %443 : vector<8x32xf32>
    %c0_182 = arith.constant 0 : index
    %c0_183 = arith.constant 0 : index
    %445 = vector.load %arg15[%c0_182, %c0_183] : memref<8x32xf32, #tpu.memory_space<vmem>>, vector<8x32xf32>
    tpu.vector_store %arg15[%c0_182, %c0_183], %408 {strides = array<i32>} : memref<8x32xf32, #tpu.memory_space<vmem>>, vector<8x32xf32>,
    %c0_184 = arith.constant 0 : index
    %c0_185 = arith.constant 0 : index
    %446 = vector.load %arg16[%c0_184, %c0_185] : memref<8x32xf32, #tpu.memory_space<vmem>>, vector<8x32xf32>
    tpu.vector_store %arg16[%c0_184, %c0_185], %444 {strides = array<i32>} : memref<8x32xf32, #tpu.memory_space<vmem>>, vector<8x32xf32>,
    %c6_i32 = arith.constant 6 : i32
    %c0_186 = arith.constant 0 : index
    %c0_187 = arith.constant 0 : index
    %447 = vector.load %arg15[%c0_186, %c0_187] : memref<8x32xf32, #tpu.memory_space<vmem>>, vector<8x32xf32>
    %c0_188 = arith.constant 0 : index
    %c0_189 = arith.constant 0 : index
    %448 = vector.load %arg16[%c0_188, %c0_189] : memref<8x32xf32, #tpu.memory_space<vmem>>, vector<8x32xf32>
    %c0_190 = arith.constant 0 : index
    %c0_191 = arith.constant 0 : index
    %449 = vector.load %arg4[%c0_190, %c0_191] : memref<32x96xf32, #tpu.memory_space<vmem>>, vector<32x96xf32>
    %cst_192 = arith.constant dense<0.000000e+00> : vector<8x96xf32>
    %450 = tpu.matmul %447, %449, %cst_192 {dimension_numbers = #tpu.dot_dimension_numbers<[1], [0], [0], [1], [0, 0, 1, 1], [], []>} : vector<8x32xf32>, vector<32x96xf32>, vector<8x96xf32> -> vector<8x96xf32>
    %c0_193 = arith.constant 0 : index
    %c0_194 = arith.constant 0 : index
    %451 = vector.load %arg5[%c0_193, %c0_194] : memref<1x96xf32, #tpu.memory_space<vmem>>, vector<1x96xf32>
    %452 = vector.broadcast %451 : vector<1x96xf32> to vector<8x96xf32>
    %453 = arith.addf %450, %452 : vector<8x96xf32>
    %454 = arith.index_cast %c6_i32 : i32 to index
    %c0_195 = arith.constant 0 : index
    %c0_196 = arith.constant 0 : index
    %455 = vector.load %arg2[%454, %c0_195, %c0_196] : memref<8x8x96xf32, #tpu.memory_space<vmem>>, vector<1x8x96xf32>
    %456 = vector.shape_cast %455 : vector<1x8x96xf32> to vector<8x96xf32>
    %457 = vector.extract_strided_slice %456 {offsets = [0, 0], sizes = [8, 32], strides = [1, 1]} : vector<8x96xf32> to vector<8x32xf32>
    %458 = vector.extract_strided_slice %453 {offsets = [0, 0], sizes = [8, 32], strides = [1, 1]} : vector<8x96xf32> to vector<8x32xf32>
    %459 = arith.addf %457, %458 : vector<8x32xf32>
    %460 = arith.negf %459 : vector<8x32xf32>
    %461 = math.exp %460 : vector<8x32xf32>
    %cst_197 = arith.constant 1.000000e+00 : f32
    %462 = vector.broadcast %cst_197 : f32 to vector<8x32xf32>
    %463 = arith.addf %462, %461 : vector<8x32xf32>
    %464 = arith.divf %462, %463 : vector<8x32xf32>
    %465 = vector.extract_strided_slice %456 {offsets = [0, 32], sizes = [8, 32], strides = [1, 1]} : vector<8x96xf32> to vector<8x32xf32>
    %466 = vector.extract_strided_slice %453 {offsets = [0, 32], sizes = [8, 32], strides = [1, 1]} : vector<8x96xf32> to vector<8x32xf32>
    %467 = arith.addf %465, %466 : vector<8x32xf32>
    %468 = arith.negf %467 : vector<8x32xf32>
    %469 = math.exp %468 : vector<8x32xf32>
    %cst_198 = arith.constant 1.000000e+00 : f32
    %470 = vector.broadcast %cst_198 : f32 to vector<8x32xf32>
    %471 = arith.addf %470, %469 : vector<8x32xf32>
    %472 = arith.divf %470, %471 : vector<8x32xf32>
    %473 = vector.extract_strided_slice %456 {offsets = [0, 64], sizes = [8, 32], strides = [1, 1]} : vector<8x96xf32> to vector<8x32xf32>
    %474 = vector.extract_strided_slice %453 {offsets = [0, 64], sizes = [8, 32], strides = [1, 1]} : vector<8x96xf32> to vector<8x32xf32>
    %475 = arith.mulf %464, %474 : vector<8x32xf32>
    %476 = arith.addf %473, %475 : vector<8x32xf32>
    %477 = math.tanh %476 : vector<8x32xf32>
    %cst_199 = arith.constant 1.000000e+00 : f32
    %478 = vector.broadcast %cst_199 : f32 to vector<8x32xf32>
    %479 = arith.subf %478, %472 : vector<8x32xf32>
    %480 = arith.mulf %479, %477 : vector<8x32xf32>
    %481 = arith.mulf %472, %447 : vector<8x32xf32>
    %482 = arith.addf %480, %481 : vector<8x32xf32>
    %c0_200 = arith.constant 0 : index
    %c0_201 = arith.constant 0 : index
    %483 = vector.load %arg6[%c0_200, %c0_201] : memref<32x96xf32, #tpu.memory_space<vmem>>, vector<32x96xf32>
    %cst_202 = arith.constant dense<0.000000e+00> : vector<8x96xf32>
    %484 = tpu.matmul %482, %483, %cst_202 {dimension_numbers = #tpu.dot_dimension_numbers<[1], [0], [0], [1], [0, 0, 1, 1], [], []>} : vector<8x32xf32>, vector<32x96xf32>, vector<8x96xf32> -> vector<8x96xf32>
    %c0_203 = arith.constant 0 : index
    %c0_204 = arith.constant 0 : index
    %485 = vector.load %arg7[%c0_203, %c0_204] : memref<1x96xf32, #tpu.memory_space<vmem>>, vector<1x96xf32>
    %486 = vector.broadcast %485 : vector<1x96xf32> to vector<8x96xf32>
    %487 = arith.addf %484, %486 : vector<8x96xf32>
    %c0_205 = arith.constant 0 : index
    %c0_206 = arith.constant 0 : index
    %488 = vector.load %arg8[%c0_205, %c0_206] : memref<32x96xf32, #tpu.memory_space<vmem>>, vector<32x96xf32>
    %cst_207 = arith.constant dense<0.000000e+00> : vector<8x96xf32>
    %489 = tpu.matmul %448, %488, %cst_207 {dimension_numbers = #tpu.dot_dimension_numbers<[1], [0], [0], [1], [0, 0, 1, 1], [], []>} : vector<8x32xf32>, vector<32x96xf32>, vector<8x96xf32> -> vector<8x96xf32>
    %c0_208 = arith.constant 0 : index
    %c0_209 = arith.constant 0 : index
    %490 = vector.load %arg9[%c0_208, %c0_209] : memref<1x96xf32, #tpu.memory_space<vmem>>, vector<1x96xf32>
    %491 = vector.broadcast %490 : vector<1x96xf32> to vector<8x96xf32>
    %492 = arith.addf %489, %491 : vector<8x96xf32>
    %493 = vector.extract_strided_slice %487 {offsets = [0, 0], sizes = [8, 32], strides = [1, 1]} : vector<8x96xf32> to vector<8x32xf32>
    %494 = vector.extract_strided_slice %492 {offsets = [0, 0], sizes = [8, 32], strides = [1, 1]} : vector<8x96xf32> to vector<8x32xf32>
    %495 = arith.addf %493, %494 : vector<8x32xf32>
    %496 = arith.negf %495 : vector<8x32xf32>
    %497 = math.exp %496 : vector<8x32xf32>
    %cst_210 = arith.constant 1.000000e+00 : f32
    %498 = vector.broadcast %cst_210 : f32 to vector<8x32xf32>
    %499 = arith.addf %498, %497 : vector<8x32xf32>
    %500 = arith.divf %498, %499 : vector<8x32xf32>
    %501 = vector.extract_strided_slice %487 {offsets = [0, 32], sizes = [8, 32], strides = [1, 1]} : vector<8x96xf32> to vector<8x32xf32>
    %502 = vector.extract_strided_slice %492 {offsets = [0, 32], sizes = [8, 32], strides = [1, 1]} : vector<8x96xf32> to vector<8x32xf32>
    %503 = arith.addf %501, %502 : vector<8x32xf32>
    %504 = arith.negf %503 : vector<8x32xf32>
    %505 = math.exp %504 : vector<8x32xf32>
    %cst_211 = arith.constant 1.000000e+00 : f32
    %506 = vector.broadcast %cst_211 : f32 to vector<8x32xf32>
    %507 = arith.addf %506, %505 : vector<8x32xf32>
    %508 = arith.divf %506, %507 : vector<8x32xf32>
    %509 = vector.extract_strided_slice %487 {offsets = [0, 64], sizes = [8, 32], strides = [1, 1]} : vector<8x96xf32> to vector<8x32xf32>
    %510 = vector.extract_strided_slice %492 {offsets = [0, 64], sizes = [8, 32], strides = [1, 1]} : vector<8x96xf32> to vector<8x32xf32>
    %511 = arith.mulf %500, %510 : vector<8x32xf32>
    %512 = arith.addf %509, %511 : vector<8x32xf32>
    %513 = math.tanh %512 : vector<8x32xf32>
    %cst_212 = arith.constant 1.000000e+00 : f32
    %514 = vector.broadcast %cst_212 : f32 to vector<8x32xf32>
    %515 = arith.subf %514, %508 : vector<8x32xf32>
    %516 = arith.mulf %515, %513 : vector<8x32xf32>
    %517 = arith.mulf %508, %448 : vector<8x32xf32>
    %518 = arith.addf %516, %517 : vector<8x32xf32>
    %c0_213 = arith.constant 0 : index
    %c0_214 = arith.constant 0 : index
    %519 = vector.load %arg15[%c0_213, %c0_214] : memref<8x32xf32, #tpu.memory_space<vmem>>, vector<8x32xf32>
    tpu.vector_store %arg15[%c0_213, %c0_214], %482 {strides = array<i32>} : memref<8x32xf32, #tpu.memory_space<vmem>>, vector<8x32xf32>,
    %c0_215 = arith.constant 0 : index
    %c0_216 = arith.constant 0 : index
    %520 = vector.load %arg16[%c0_215, %c0_216] : memref<8x32xf32, #tpu.memory_space<vmem>>, vector<8x32xf32>
    tpu.vector_store %arg16[%c0_215, %c0_216], %518 {strides = array<i32>} : memref<8x32xf32, #tpu.memory_space<vmem>>, vector<8x32xf32>,
    %c7_i32 = arith.constant 7 : i32
    %c0_217 = arith.constant 0 : index
    %c0_218 = arith.constant 0 : index
    %521 = vector.load %arg15[%c0_217, %c0_218] : memref<8x32xf32, #tpu.memory_space<vmem>>, vector<8x32xf32>
    %c0_219 = arith.constant 0 : index
    %c0_220 = arith.constant 0 : index
    %522 = vector.load %arg16[%c0_219, %c0_220] : memref<8x32xf32, #tpu.memory_space<vmem>>, vector<8x32xf32>
    %c0_221 = arith.constant 0 : index
    %c0_222 = arith.constant 0 : index
    %523 = vector.load %arg4[%c0_221, %c0_222] : memref<32x96xf32, #tpu.memory_space<vmem>>, vector<32x96xf32>
    %cst_223 = arith.constant dense<0.000000e+00> : vector<8x96xf32>
    %524 = tpu.matmul %521, %523, %cst_223 {dimension_numbers = #tpu.dot_dimension_numbers<[1], [0], [0], [1], [0, 0, 1, 1], [], []>} : vector<8x32xf32>, vector<32x96xf32>, vector<8x96xf32> -> vector<8x96xf32>
    %c0_224 = arith.constant 0 : index
    %c0_225 = arith.constant 0 : index
    %525 = vector.load %arg5[%c0_224, %c0_225] : memref<1x96xf32, #tpu.memory_space<vmem>>, vector<1x96xf32>
    %526 = vector.broadcast %525 : vector<1x96xf32> to vector<8x96xf32>
    %527 = arith.addf %524, %526 : vector<8x96xf32>
    %528 = arith.index_cast %c7_i32 : i32 to index
    %c0_226 = arith.constant 0 : index
    %c0_227 = arith.constant 0 : index
    %529 = vector.load %arg2[%528, %c0_226, %c0_227] : memref<8x8x96xf32, #tpu.memory_space<vmem>>, vector<1x8x96xf32>
    %530 = vector.shape_cast %529 : vector<1x8x96xf32> to vector<8x96xf32>
    %531 = vector.extract_strided_slice %530 {offsets = [0, 0], sizes = [8, 32], strides = [1, 1]} : vector<8x96xf32> to vector<8x32xf32>
    %532 = vector.extract_strided_slice %527 {offsets = [0, 0], sizes = [8, 32], strides = [1, 1]} : vector<8x96xf32> to vector<8x32xf32>
    %533 = arith.addf %531, %532 : vector<8x32xf32>
    %534 = arith.negf %533 : vector<8x32xf32>
    %535 = math.exp %534 : vector<8x32xf32>
    %cst_228 = arith.constant 1.000000e+00 : f32
    %536 = vector.broadcast %cst_228 : f32 to vector<8x32xf32>
    %537 = arith.addf %536, %535 : vector<8x32xf32>
    %538 = arith.divf %536, %537 : vector<8x32xf32>
    %539 = vector.extract_strided_slice %530 {offsets = [0, 32], sizes = [8, 32], strides = [1, 1]} : vector<8x96xf32> to vector<8x32xf32>
    %540 = vector.extract_strided_slice %527 {offsets = [0, 32], sizes = [8, 32], strides = [1, 1]} : vector<8x96xf32> to vector<8x32xf32>
    %541 = arith.addf %539, %540 : vector<8x32xf32>
    %542 = arith.negf %541 : vector<8x32xf32>
    %543 = math.exp %542 : vector<8x32xf32>
    %cst_229 = arith.constant 1.000000e+00 : f32
    %544 = vector.broadcast %cst_229 : f32 to vector<8x32xf32>
    %545 = arith.addf %544, %543 : vector<8x32xf32>
    %546 = arith.divf %544, %545 : vector<8x32xf32>
    %547 = vector.extract_strided_slice %530 {offsets = [0, 64], sizes = [8, 32], strides = [1, 1]} : vector<8x96xf32> to vector<8x32xf32>
    %548 = vector.extract_strided_slice %527 {offsets = [0, 64], sizes = [8, 32], strides = [1, 1]} : vector<8x96xf32> to vector<8x32xf32>
    %549 = arith.mulf %538, %548 : vector<8x32xf32>
    %550 = arith.addf %547, %549 : vector<8x32xf32>
    %551 = math.tanh %550 : vector<8x32xf32>
    %cst_230 = arith.constant 1.000000e+00 : f32
    %552 = vector.broadcast %cst_230 : f32 to vector<8x32xf32>
    %553 = arith.subf %552, %546 : vector<8x32xf32>
    %554 = arith.mulf %553, %551 : vector<8x32xf32>
    %555 = arith.mulf %546, %521 : vector<8x32xf32>
    %556 = arith.addf %554, %555 : vector<8x32xf32>
    %c0_231 = arith.constant 0 : index
    %c0_232 = arith.constant 0 : index
    %557 = vector.load %arg6[%c0_231, %c0_232] : memref<32x96xf32, #tpu.memory_space<vmem>>, vector<32x96xf32>
    %cst_233 = arith.constant dense<0.000000e+00> : vector<8x96xf32>
    %558 = tpu.matmul %556, %557, %cst_233 {dimension_numbers = #tpu.dot_dimension_numbers<[1], [0], [0], [1], [0, 0, 1, 1], [], []>} : vector<8x32xf32>, vector<32x96xf32>, vector<8x96xf32> -> vector<8x96xf32>
    %c0_234 = arith.constant 0 : index
    %c0_235 = arith.constant 0 : index
    %559 = vector.load %arg7[%c0_234, %c0_235] : memref<1x96xf32, #tpu.memory_space<vmem>>, vector<1x96xf32>
    %560 = vector.broadcast %559 : vector<1x96xf32> to vector<8x96xf32>
    %561 = arith.addf %558, %560 : vector<8x96xf32>
    %c0_236 = arith.constant 0 : index
    %c0_237 = arith.constant 0 : index
    %562 = vector.load %arg8[%c0_236, %c0_237] : memref<32x96xf32, #tpu.memory_space<vmem>>, vector<32x96xf32>
    %cst_238 = arith.constant dense<0.000000e+00> : vector<8x96xf32>
    %563 = tpu.matmul %522, %562, %cst_238 {dimension_numbers = #tpu.dot_dimension_numbers<[1], [0], [0], [1], [0, 0, 1, 1], [], []>} : vector<8x32xf32>, vector<32x96xf32>, vector<8x96xf32> -> vector<8x96xf32>
    %c0_239 = arith.constant 0 : index
    %c0_240 = arith.constant 0 : index
    %564 = vector.load %arg9[%c0_239, %c0_240] : memref<1x96xf32, #tpu.memory_space<vmem>>, vector<1x96xf32>
    %565 = vector.broadcast %564 : vector<1x96xf32> to vector<8x96xf32>
    %566 = arith.addf %563, %565 : vector<8x96xf32>
    %567 = vector.extract_strided_slice %561 {offsets = [0, 0], sizes = [8, 32], strides = [1, 1]} : vector<8x96xf32> to vector<8x32xf32>
    %568 = vector.extract_strided_slice %566 {offsets = [0, 0], sizes = [8, 32], strides = [1, 1]} : vector<8x96xf32> to vector<8x32xf32>
    %569 = arith.addf %567, %568 : vector<8x32xf32>
    %570 = arith.negf %569 : vector<8x32xf32>
    %571 = math.exp %570 : vector<8x32xf32>
    %cst_241 = arith.constant 1.000000e+00 : f32
    %572 = vector.broadcast %cst_241 : f32 to vector<8x32xf32>
    %573 = arith.addf %572, %571 : vector<8x32xf32>
    %574 = arith.divf %572, %573 : vector<8x32xf32>
    %575 = vector.extract_strided_slice %561 {offsets = [0, 32], sizes = [8, 32], strides = [1, 1]} : vector<8x96xf32> to vector<8x32xf32>
    %576 = vector.extract_strided_slice %566 {offsets = [0, 32], sizes = [8, 32], strides = [1, 1]} : vector<8x96xf32> to vector<8x32xf32>
    %577 = arith.addf %575, %576 : vector<8x32xf32>
    %578 = arith.negf %577 : vector<8x32xf32>
    %579 = math.exp %578 : vector<8x32xf32>
    %cst_242 = arith.constant 1.000000e+00 : f32
    %580 = vector.broadcast %cst_242 : f32 to vector<8x32xf32>
    %581 = arith.addf %580, %579 : vector<8x32xf32>
    %582 = arith.divf %580, %581 : vector<8x32xf32>
    %583 = vector.extract_strided_slice %561 {offsets = [0, 64], sizes = [8, 32], strides = [1, 1]} : vector<8x96xf32> to vector<8x32xf32>
    %584 = vector.extract_strided_slice %566 {offsets = [0, 64], sizes = [8, 32], strides = [1, 1]} : vector<8x96xf32> to vector<8x32xf32>
    %585 = arith.mulf %574, %584 : vector<8x32xf32>
    %586 = arith.addf %583, %585 : vector<8x32xf32>
    %587 = math.tanh %586 : vector<8x32xf32>
    %cst_243 = arith.constant 1.000000e+00 : f32
    %588 = vector.broadcast %cst_243 : f32 to vector<8x32xf32>
    %589 = arith.subf %588, %582 : vector<8x32xf32>
    %590 = arith.mulf %589, %587 : vector<8x32xf32>
    %591 = arith.mulf %582, %522 : vector<8x32xf32>
    %592 = arith.addf %590, %591 : vector<8x32xf32>
    %c0_244 = arith.constant 0 : index
    %c0_245 = arith.constant 0 : index
    %593 = vector.load %arg15[%c0_244, %c0_245] : memref<8x32xf32, #tpu.memory_space<vmem>>, vector<8x32xf32>
    tpu.vector_store %arg15[%c0_244, %c0_245], %556 {strides = array<i32>} : memref<8x32xf32, #tpu.memory_space<vmem>>, vector<8x32xf32>,
    %c0_246 = arith.constant 0 : index
    %c0_247 = arith.constant 0 : index
    %594 = vector.load %arg16[%c0_246, %c0_247] : memref<8x32xf32, #tpu.memory_space<vmem>>, vector<8x32xf32>
    tpu.vector_store %arg16[%c0_246, %c0_247], %592 {strides = array<i32>} : memref<8x32xf32, #tpu.memory_space<vmem>>, vector<8x32xf32>,
    %c8_i32 = arith.constant 8 : i32
    %c0_i32_248 = arith.constant 0 : i32
    %595 = arith.cmpi eq, %arg1, %c0_i32_248 : i32
    %596 = arith.extui %595 : i1 to i32
    %c0_i32_249 = arith.constant 0 : i32
    %597 = arith.cmpi ne, %596, %c0_i32_249 : i32
    scf.if %597 {
      %c0_250 = arith.constant 0 : index
      %c0_251 = arith.constant 0 : index
      %598 = vector.load %arg16[%c0_250, %c0_251] : memref<8x32xf32, #tpu.memory_space<vmem>>, vector<8x32xf32>
      %c0_252 = arith.constant 0 : index
      %c0_253 = arith.constant 0 : index
      %599 = vector.load %arg10[%c0_252, %c0_253] : memref<32x64xf32, #tpu.memory_space<vmem>>, vector<32x64xf32>
      %cst_254 = arith.constant dense<0.000000e+00> : vector<8x64xf32>
      %600 = tpu.matmul %598, %599, %cst_254 {dimension_numbers = #tpu.dot_dimension_numbers<[1], [0], [0], [1], [0, 0, 1, 1], [], []>} : vector<8x32xf32>, vector<32x64xf32>, vector<8x64xf32> -> vector<8x64xf32>
      %c0_255 = arith.constant 0 : index
      %c0_256 = arith.constant 0 : index
      %601 = vector.load %arg11[%c0_255, %c0_256] : memref<1x64xf32, #tpu.memory_space<vmem>>, vector<1x64xf32>
      %602 = vector.broadcast %601 : vector<1x64xf32> to vector<8x64xf32>
      %603 = arith.addf %600, %602 : vector<8x64xf32>
      %cst_257 = arith.constant 0.000000e+00 : f32
      %604 = vector.broadcast %cst_257 : f32 to vector<8x64xf32>
      %605 = arith.maximumf %603, %604 : vector<8x64xf32>
      %c0_258 = arith.constant 0 : index
      %c0_259 = arith.constant 0 : index
      %606 = vector.load %arg12[%c0_258, %c0_259] : memref<64x128xf32, #tpu.memory_space<vmem>>, vector<64x128xf32>
      %cst_260 = arith.constant dense<0.000000e+00> : vector<8x128xf32>
      %607 = tpu.matmul %605, %606, %cst_260 {dimension_numbers = #tpu.dot_dimension_numbers<[1], [0], [0], [1], [0, 0, 1, 1], [], []>} : vector<8x64xf32>, vector<64x128xf32>, vector<8x128xf32> -> vector<8x128xf32>
      %c0_261 = arith.constant 0 : index
      %c0_262 = arith.constant 0 : index
      %608 = vector.load %arg13[%c0_261, %c0_262] : memref<1x128xf32, #tpu.memory_space<vmem>>, vector<1x128xf32>
      %609 = vector.broadcast %608 : vector<1x128xf32> to vector<8x128xf32>
      %610 = arith.addf %607, %609 : vector<8x128xf32>
      %c0_263 = arith.constant 0 : index
      %c0_264 = arith.constant 0 : index
      %611 = vector.load %arg14[%c0_263, %c0_264] : memref<8x128xf32, #tpu.memory_space<vmem>>, vector<8x128xf32>
      tpu.vector_store %arg14[%c0_263, %c0_264], %610 {strides = array<i32>} : memref<8x128xf32, #tpu.memory_space<vmem>>, vector<8x128xf32>,
    } else {
    }
    return
  }
  func.func @transform_0(%arg0: i32, %arg1: i32) -> (i32, i32, i32) {
    %c0_i32 = arith.constant 0 : i32
    %c0_i32_0 = arith.constant 0 : i32
    return %arg1, %arg0, %c0_i32 : i32, i32, i32
  }
  func.func @transform_1(%arg0: i32, %arg1: i32) -> (i32, i32, i32) {
    %c0_i32 = arith.constant 0 : i32
    %c0_i32_0 = arith.constant 0 : i32
    %c0_i32_1 = arith.constant 0 : i32
    return %c0_i32, %arg0, %c0_i32_0 : i32, i32, i32
  }
  func.func @transform_2(%arg0: i32, %arg1: i32) -> (i32, i32) {
    %c0_i32 = arith.constant 0 : i32
    %c0_i32_0 = arith.constant 0 : i32
    %c0_i32_1 = arith.constant 0 : i32
    return %c0_i32, %c0_i32_0 : i32, i32
  }
  func.func @transform_3(%arg0: i32, %arg1: i32) -> (i32, i32) {
    %c0_i32 = arith.constant 0 : i32
    %c0_i32_0 = arith.constant 0 : i32
    %c0_i32_1 = arith.constant 0 : i32
    return %c0_i32, %c0_i32_0 : i32, i32
  }
  func.func @transform_4(%arg0: i32, %arg1: i32) -> (i32, i32) {
    %c0_i32 = arith.constant 0 : i32
    %c0_i32_0 = arith.constant 0 : i32
    %c0_i32_1 = arith.constant 0 : i32
    return %c0_i32, %c0_i32_0 : i32, i32
  }
  func.func @transform_5(%arg0: i32, %arg1: i32) -> (i32, i32) {
    %c0_i32 = arith.constant 0 : i32
    %c0_i32_0 = arith.constant 0 : i32
    %c0_i32_1 = arith.constant 0 : i32
    return %c0_i32, %c0_i32_0 : i32, i32
  }
  func.func @transform_6(%arg0: i32, %arg1: i32) -> (i32, i32) {
    %c0_i32 = arith.constant 0 : i32
    %c0_i32_0 = arith.constant 0 : i32
    %c0_i32_1 = arith.constant 0 : i32
    return %c0_i32, %c0_i32_0 : i32, i32
  }
  func.func @transform_7(%arg0: i32, %arg1: i32) -> (i32, i32) {
    %c0_i32 = arith.constant 0 : i32
    %c0_i32_0 = arith.constant 0 : i32
    %c0_i32_1 = arith.constant 0 : i32
    return %c0_i32, %c0_i32_0 : i32, i32
  }
  func.func @transform_8(%arg0: i32, %arg1: i32) -> (i32, i32) {
    %c0_i32 = arith.constant 0 : i32
    %c0_i32_0 = arith.constant 0 : i32
    %c0_i32_1 = arith.constant 0 : i32
    return %c0_i32, %c0_i32_0 : i32, i32
  }
  func.func @transform_9(%arg0: i32, %arg1: i32) -> (i32, i32) {
    %c0_i32 = arith.constant 0 : i32
    %c0_i32_0 = arith.constant 0 : i32
    %c0_i32_1 = arith.constant 0 : i32
    return %c0_i32, %c0_i32_0 : i32, i32
  }
  func.func @transform_10(%arg0: i32, %arg1: i32) -> (i32, i32) {
    %c0_i32 = arith.constant 0 : i32
    %c0_i32_0 = arith.constant 0 : i32
    %c0_i32_1 = arith.constant 0 : i32
    return %c0_i32, %c0_i32_0 : i32, i32
  }
  func.func @transform_11(%arg0: i32, %arg1: i32) -> (i32, i32) {
    %c0_i32 = arith.constant 0 : i32
    %c0_i32_0 = arith.constant 0 : i32
    %c0_i32_1 = arith.constant 0 : i32
    return %c0_i32, %c0_i32_0 : i32, i32
  }
  func.func @transform_12(%arg0: i32, %arg1: i32) -> (i32, i32) {
    %c0_i32 = arith.constant 0 : i32
    %c0_i32_0 = arith.constant 0 : i32
    return %arg0, %c0_i32 : i32, i32
  }
}

</mosaic_0001>

<bundles_post_ra>
// kernel: embedded_gru_forward.2
= control target key start
LH: loop header
LB: loop body
LE: loop exit
PB: predicated region body
PF: predicated region fallthrough
CT: control target
= control target key end

     0   :  { %vm37_vm0 = vcmask 523264   ;;  %vm167_vm1 = vcmask 785408   ;;  %s368_s1 = inlined_call_operand.vmem [shape: f32[64,96], index: 1, kind: input, shape index: {}]   ;;  %s369_s0 = inlined_call_operand.vmem [shape: f32[64,64], index: 0, kind: input, shape index: {}]   ;;  %s370_s2 = inlined_call_operand.vmem [shape: f32[1,96], index: 2, kind: input, shape index: {}]   ;;  %s371_s3 = inlined_call_operand.vmem [shape: f32[64,96], index: 3, kind: output, shape index: {}]  }
   0x1   :  { %v22_v0 = vld [vmem:[%s368_s1] sm:$0xff]  ;;  %v23_v1 = vld [vmem:[%s368_s1 + $0x8] sm:$0xff]  ;;  %v24_v2 = vld [vmem:[%s368_s1 + $0x10] sm:$0xff] }
   0x2   :  { %v233_v3 = vpack.c.bf16 %v23_v1, %v22_v0  ;;  %v25_v4 = vld [vmem:[%s368_s1 + $0x18] sm:$0xff]  ;;  %v26_v6 = vld [vmem:[%s368_s1 + $0x20] sm:$0xff]  ;;  %v27_v7 = vld [vmem:[%s368_s1 + $0x28] sm:$0xff] }
   0x3   :  { %v237_v5 = vpack.c.bf16 %v25_v4, %v24_v2  ;;  %v14_v8 = vld [vmem:[%s369_s0] sm:$0xff]  ;;  %v241_v10 = vpack.c.bf16 %v27_v7, %v26_v6  ;;  %v28_v11 = vld [vmem:[%s368_s1 + $0x30] sm:$0xff]  ;;  %v29_v12 = vld [vmem:[%s368_s1 + $0x38] sm:$0xff] }
   0x4   :  { %234 = vmatprep.subr.bf16.mxu0 %v233_v3  ;;  %249 = vmatprep.subr.bf16.mxu1 %v233_v3  ;;  %v18_v9 = vld [vmem:[%s369_s0 + $0x20] sm:$0xff]  ;;  %v245_v13 = vpack.c.bf16 %v29_v12, %v28_v11  ;;  %v15_v14 = vld [vmem:[%s369_s0 + $0x8] sm:$0xff]  ;;  %v16_v16 = vld [vmem:[%s369_s0 + $0x10] sm:$0xff] }
   0x5   :  { %236 = vmatpush3.bf16.msra.mxu0 %v233_v3  ;;  %253 = vmatpush3.bf16.msra.mxu1 %v233_v3  ;;  %v19_v15 = vld [vmem:[%s369_s0 + $0x28] sm:$0xff]  ;;  %v20_v17 = vld [vmem:[%s369_s0 + $0x30] sm:$0xff]  ;;  %v17_v18 = vld [vmem:[%s369_s0 + $0x18] sm:$0xff] }
   0x6   :  { %238 = vmatprep.subr.bf16.mxu0 %v237_v5  ;;  %250 = vmatprep.subr.bf16.mxu1 %v237_v5  ;;  %v21_v19 = vld [vmem:[%s369_s0 + $0x38] sm:$0xff]  ;;  %v180_v20 = vld [vmem:[%s370_s2] ss:$0 sm:$0xff] }
   0x7   :  { %221 = vmatprep.mubr.msk.f32.mxu0 %vm37_vm0, %v14_v8  ;;  %227 = vmatprep.mubr.msk.f32.mxu1 %vm37_vm0, %v18_v9 }
   0x9   :  { %240 = vmatpush3.bf16.msra.mxu0 %v237_v5  ;;  %254 = vmatpush3.bf16.msra.mxu1 %v237_v5 }
   0xa   :  { %242 = vmatprep.subr.bf16.mxu0 %v241_v10  ;;  %251 = vmatprep.subr.bf16.mxu1 %v241_v10 }
   0xd   :  { %244 = vmatpush3.bf16.msra.mxu0 %v241_v10  ;;  %255 = vmatpush3.bf16.msra.mxu1 %v241_v10 }
   0xe   :  { %246 = vmatprep.subr.bf16.mxu0 %v245_v13  ;;  %252 = vmatprep.subr.bf16.mxu1 %v245_v13 }
  0x11   :  { %248 = vmatpush3.bf16.msra.mxu0 %v245_v13  ;;  %256 = vmatpush3.bf16.msra.mxu1 %v245_v13 }
  0x14   :  { %222 = vmatmul.mubr.msk.f32.vlgmr.msra.gmra.mrb[0].mxu0 %vm37_vm0, %v15_v14  ;;  %228 = vmatmul.mubr.msk.f32.vlgmr.msra.gmra.mrb[0].mxu1 %vm37_vm0, %v19_v15 }
  0x15   :  { %224 = vmatprep.mubr.msk.f32.mxu0 %vm37_vm0, %v16_v16  ;;  %230 = vmatprep.mubr.msk.f32.mxu1 %vm37_vm0, %v20_v17 }
  0x18   :  { %225 = vmatmul.mubr.msk.f32.gmra.mrb[2].mxu0 %vm37_vm0, %v17_v18  ;;  %231 = vmatmul.mubr.msk.f32.gmra.mrb[2].mxu1 %vm37_vm0, %v21_v19 }
  0xe7   :  { %v223_v21 = vpop.f32.mrb[0].mxu0  ;;  %v229_v22 = vpop.f32.mrb[0].mxu1 }
  0xe8   :  { %v134_v23 = vadd.f32 %v223_v21, %v180_v20  ;;  %v154_v24 = vadd.f32 %v229_v22, %v180_v20  ;;  %v128_v25 = vpop.f32.mrb[1].mxu0  ;;  %v148_v26 = vpop.f32.mrb[1].mxu1 }
  0xe9   :  { %v129_v27 = vadd.f32 %v180_v20, %v128_v25  ;;  %v149_v28 = vadd.f32 %v180_v20, %v148_v26 }
  0xea   :  { %169 = vst.msk [vmem:[%s371_s3 + $0x8] sm:$0xff] %vm167_vm1, %v134_v23  ;;  %173 = vst.msk [vmem:[%s371_s3 + $0x28] sm:$0xff] %vm167_vm1, %v154_v24 }
  0xeb   :  { %168 = vst.msk [vmem:[%s371_s3] sm:$0xff] %vm167_vm1, %v129_v27  ;;  %172 = vst.msk [vmem:[%s371_s3 + $0x20] sm:$0xff] %vm167_vm1, %v149_v28  ;;  %v226_v29 = vpop.f32.mrb[2].mxu0  ;;  %v232_v30 = vpop.f32.mrb[2].mxu1 }
  0xec   :  { %v144_v31 = vadd.f32 %v226_v29, %v180_v20  ;;  %v164_v32 = vadd.f32 %v232_v30, %v180_v20  ;;  %v138_v33 = vpop.f32.mrb[3].mxu0  ;;  %v158_v34 = vpop.f32.mrb[3].mxu1 }
  0xed   :  { %v139_v35 = vadd.f32 %v180_v20, %v138_v33  ;;  %v159_v36 = vadd.f32 %v180_v20, %v158_v34 }
  0xee   :  { %171 = vst.msk [vmem:[%s371_s3 + $0x18] sm:$0xff] %vm167_vm1, %v144_v31  ;;  %175 = vst.msk [vmem:[%s371_s3 + $0x38] sm:$0xff] %vm167_vm1, %v164_v32 }
  0xef   :  { %170 = vst.msk [vmem:[%s371_s3 + $0x10] sm:$0xff] %vm167_vm1, %v139_v35  ;;  %174 = vst.msk [vmem:[%s371_s3 + $0x30] sm:$0xff] %vm167_vm1, %v159_v36 }

// kernel: embedded_gru_forward.3
= control target key start
LH: loop header
LB: loop body
LE: loop exit
PB: predicated region body
PF: predicated region fallthrough
CT: control target
= control target key end

     0   :  { %vm46_vm0 = vcmask 261120   ;;  %v3586_v0 = vmov 0.0|0.0   ;;  %vm3587_vm1 = vmmov 0   ;;  %v3588_v4 = vmov 0.0   ;;  %s3589_s16 = smov 64   ;;  %s3590_s17 = smov 96   ;;  %s4147_s2 = inlined_call_operand.vmem [shape: f32[32,96], index: 2, kind: input, shape index: {}]   ;;  %s4148_s1 = inlined_call_operand.vmem [shape: f32[2,8,32], index: 1, kind: input, shape index: {}]   ;;  %s4149_s3 = inlined_call_operand.vmem [shape: f32[1,96], index: 3, kind: input, shape index: {}]   ;;  %s4150_s0 = inlined_call_operand.vmem [shape: f32[8,8,96], index: 0, kind: input, shape index: {}]   ;;  %s4151_s6 = inlined_call_operand.vmem [shape: f32[32,96], index: 6, kind: input, shape index: {}]   ;;  %s4152_s4 = inlined_call_operand.vmem [shape: f32[32,96], index: 4, kind: input, shape index: {}]   ;;  %s4153_s7 = inlined_call_operand.vmem [shape: f32[1,96], index: 7, kind: input, shape index: {}]   ;;  %s4154_s5 = inlined_call_operand.vmem [shape: f32[1,96], index: 5, kind: input, shape index: {}]   ;;  %s4155_s8 = inlined_call_operand.vmem [shape: f32[32,64], index: 8, kind: input, shape index: {}]   ;;  %s4156_s10 = inlined_call_operand.vmem [shape: f32[64,128], index: 10, kind: input, shape index: {}]   ;;  %s4157_s9 = inlined_call_operand.vmem [shape: f32[1,64], index: 9, kind: input, shape index: {}]   ;;  %s4158_s11 = inlined_call_operand.vmem [shape: f32[1,128], index: 11, kind: input, shape index: {}]   ;;  %s4159_s12 = inlined_call_operand.vmem [shape: f32[8,128], index: 12, kind: output, shape index: {}]  }
   0x1   :  { %3322 = vmatprep.subr.bf16.mxu0 %v3586_v0  ;;  %v53_v1 = vld [vmem:[%s4147_s2] sm:$0xff]  ;;  %v54_v2 = vld [vmem:[%s4147_s2 + $0x8] sm:$0xff]  ;;  %v55_v3 = vld [vmem:[%s4147_s2 + $0x10] sm:$0xff]  ;;  %3036 = vmatprep.mubr.msk.f32.mxu0 %vm3587_vm1, %v3588_v4  ;;  %s3591_s18 = smov 32   ;;  %vm2739_vm2 = vcmask 523264  }
   0x2   :  { %v3669_v5 = vpack.c.bf16 %v54_v2, %v53_v1  ;;  %v56_v6 = vld [vmem:[%s4147_s2 + $0x18] sm:$0xff]  ;;  %v45_v7 = vld [vmem:[%s4148_s1] sm:$0xff]  ;;  %v2818_v8 = vld [vmem:[%s4148_s1 + $0x8] sm:$0xff]  ;;  %3328 = vmatprep.subr.bf16.mxu1 %v3586_v0  ;;  %3047 = vmatprep.mubr.msk.f32.mxu1 %vm3587_vm1, %v3588_v4 }
   0x3   :  { %47 = vst.msk [vmem:[#allocation2] sm:$0xff] %vm46_vm0, %v45_v7  ;;  %50 = vst.msk [vmem:[#allocation3] sm:$0xff] %vm46_vm0, %v2818_v8  ;;  %v3686_v9 = vpack.c.bf16 %v56_v6, %v55_v3  ;;  %v3697_v11 = vld [vmem:[%s4149_s3] ss:$0 sm:$0xff]  ;;  %v255_v26 = vld [vmem:[%s4151_s6 + $0x8] sm:$0xff] }
   0x4   :  { %3324 = vmatpush3.bf16.msra.mxu0 %v3669_v5  ;;  %v138_v15 = vld [vmem:[%s4150_s0] sm:$0xff]  ;;  %v256_v27 = vld [vmem:[%s4151_s6 + $0x10] sm:$0xff]  ;;  %v257_v29 = vld [vmem:[%s4151_s6 + $0x18] sm:$0xff] }
   0x5   :  { %3325 = vmatprep.subr.bf16.mxu0 %v3586_v0  ;;  %v254_v25 = vld [vmem:[%s4151_s6] sm:$0xff]  ;;  %v169_v31 = vld [vmem:[%s4152_s4 + $0x8] sm:$0xff]  ;;  %v170_v33 = vld [vmem:[%s4152_s4 + $0x10] sm:$0xff]  ;;  %v3734_v36 = vpack.c.bf16 %v257_v29, %v256_v27 }
   0x6   :  { %v3714_v28 = vpack.c.bf16 %v255_v26, %v254_v25  ;;  %v168_v30 = vld [vmem:[%s4152_s4] sm:$0xff]  ;;  %v171_v34 = vld [vmem:[%s4152_s4 + $0x18] sm:$0xff]  ;;  %v2829_v2 = vld [vmem:[%s4150_s0 + $0x8] sm:$0xff] }
   0x7   :  { %v3725_v32 = vpack.c.bf16 %v169_v31, %v168_v30  ;;  %v3739_v37 = vpack.c.bf16 %v171_v34, %v170_v33  ;;  %v3761_v45 = vld [vmem:[%s4153_s7] ss:$0 sm:$0xff] }
   0x8   :  { %3327 = vmatpush3.bf16.msra.mxu0 %v3686_v9  ;;  %v3783_v51 = vld [vmem:[%s4154_s5] ss:$0 sm:$0xff] }
   0x9   :  { %3334 = vmatprep.subr.bf16.mxu0 %v3586_v0  ;;  %3330 = vmatpush3.bf16.msra.mxu1 %v3725_v32 }
   0xa   :  { %v51_v10 = vld [vmem:[#allocation2] sm:$0xff]  ;;  %3331 = vmatprep.subr.bf16.mxu1 %v3586_v0  ;;  %v3743_v38 = vld [vmem:[#allocation3] sm:$0xff] }
   0xb   :  { %3037 = vmatmul.mubr.msk.f32.vlgmr.msra.gmra.mrb[0].mxu0 %vm46_vm0, %v51_v10 }
   0xc   :  { %3058 = vmatprep.mubr.msk.f32.mxu0 %vm3587_vm1, %v3588_v4  ;;  %3336 = vmatpush3.bf16.msra.mxu0 %v3714_v28 }
   0xd   :  { %3337 = vmatprep.subr.bf16.mxu0 %v3586_v0  ;;  %3333 = vmatpush3.bf16.msra.mxu1 %v3739_v37 }
   0xe   :  { %3340 = vmatprep.subr.bf16.mxu1 %v3586_v0 }
  0x10   :  { %3339 = vmatpush3.bf16.msra.mxu0 %v3734_v36 }
  0x11   :  { %3346 = vmatprep.subr.bf16.mxu0 %v3586_v0 }
  0x13   :  { %3059 = vmatmul.mubr.msk.f32.vlgmr.msra.gmra.mrb[2].mxu0 %vm46_vm0, %v3743_v38 }
  0x14   :  { %3348 = vmatpush3.bf16.msra.mxu0 %v3725_v32  ;;  %3080 = vmatprep.mubr.msk.f32.mxu0 %vm3587_vm1, %v3588_v4 }
  0x15   :  { %3349 = vmatprep.subr.bf16.mxu0 %v3586_v0 }
  0x18   :  { %3351 = vmatpush3.bf16.msra.mxu0 %v3739_v37 }
  0x19   :  { %3358 = vmatprep.subr.bf16.mxu0 %v3586_v0 }
  0xde   :  { %v134_v12 = vpop.f32.mrb[0].mxu0 }
  0xdf   :  { %v135_v13 = vadd.f32 %v3697_v11, %v134_v12  ;;  %v3038_v14 = vpop.f32.mrb[1].mxu0 }
  0xe1   :  { %147 = vrot.lane.b32.xlu0 %v135_v13, %s3589_s16  ;;  %v139_v16 = vadd.f32 %v138_v15, %v135_v13 }
  0xe3   :  { %v2821_v17 = vmul.f32 -1.442695, %v139_v16 }
  0xe5   :  { %3490 = vpow2.f32 %v2821_v17 }
  0xe6   :  { %v334_v46 = vpop.f32.mrb[2].mxu0 }
  0xe7   :  { %v335_v47 = vadd.f32 %v3761_v45, %v334_v46  ;;  %v3060_v48 = vpop.f32.mrb[3].mxu0 }
  0xef   :  { %v3491_v18 = vpop.eup %3490 }
  0xf0   :  { %v143_v19 = vadd.f32 1.0, %v3491_v18 }
  0xf2   :  { %3492 = vrcp.f32 %v143_v19 }
  0xfc   :  { %v3493_v20 = vpop.eup %3492 }
  0xfd   :  { %v157_v40 = vsub.f32 1.0, %v3493_v20 }
 0x153   :  { %v148_v21 = vpop.permute.xlu0 %147 }
 0x154   :  { %v150_v22 = vmul.f32 %v3493_v20, %v148_v21 }
 0x156   :  { %152 = vrot.lane.b32.xlu0 %v150_v22, %s3589_s16 }
 0x1c8   :  { %v153_v23 = vpop.permute.xlu0 %152 }
 0x1c9   :  { %v155_v24 = vadd.f32 %v153_v23, %v138_v15 }
 0x1cb   :  { %3494 = vtanh.f32 %v155_v24 }
 0x1d5   :  { %v3495_v35 = vpop.eup %3494 }
 0x1d6   :  { %159 = vrot.lane.b32.xlu1 %v3495_v35, %s3590_s17 }
 0x1da   :  { %163 = vrot.lane.b32.xlu1 %v51_v10, %s3591_s18 }
 0x1de   :  { %346 = vrot.lane.b32.xlu1 %v335_v47, %s3589_s16 }
 0x248   :  { %v160_v39 = vpop.permute.xlu1 %159 }
 0x249   :  { %v162_v42 = vmul.f32 %v160_v39, %v157_v40 }
 0x24c   :  { %v164_v41 = vpop.permute.xlu1 %163 }
 0x24d   :  { %v166_v43 = vmul.f32 %v3493_v20, %v164_v41 }
 0x24f   :  { %v167_v44 = vadd.f32 %v166_v43, %v162_v42 }
 0x250   :  { %v347_v62 = vpop.permute.xlu1 %346 }
 0x251   :  { %180 = vrot.lane.b32.xlu0 %v167_v44, %s3590_s17 }
 0x2c3   :  { %v181_v49 = vpop.permute.xlu0 %180 }
 0x2c4   :  { %368 = vst.msk [vmem:[#allocation2] sm:$0xff] %vm46_vm0, %v181_v49  ;;  %3048 = vmatmul.mubr.msk.f32.vlgmr.msra.gmra.mrb[0].mxu1 %vm46_vm0, %v181_v49 }
 0x2c5   :  { %3342 = vmatpush3.bf16.msra.mxu1 %v3669_v5  ;;  %3069 = vmatprep.mubr.msk.f32.mxu1 %vm3587_vm1, %v3588_v4 }
 0x2c6   :  { %3343 = vmatprep.subr.bf16.mxu1 %v3586_v0 }
 0x2c9   :  { %3345 = vmatpush3.bf16.msra.mxu1 %v3686_v9 }
 0x2ca   :  { %3352 = vmatprep.subr.bf16.mxu1 %v3586_v0 }
 0x2cb   :  { %v374_v50 = vld [vmem:[#allocation2] sm:$0xff] }
 0x2cc   :  { %3070 = vmatmul.mubr.msk.f32.vlgmr.msra.gmra.mrb[2].mxu1 %vm46_vm0, %v374_v50 }
 0x2cd   :  { %3354 = vmatpush3.bf16.msra.mxu1 %v3714_v28  ;;  %3091 = vmatprep.mubr.msk.f32.mxu1 %vm3587_vm1, %v3588_v4 }
 0x2ce   :  { %3355 = vmatprep.subr.bf16.mxu1 %v3586_v0 }
 0x2d1   :  { %3357 = vmatpush3.bf16.msra.mxu1 %v3734_v36 }
 0x2d2   :  { %3364 = vmatprep.subr.bf16.mxu1 %v3586_v0 }
 0x397   :  { %v250_v52 = vpop.f32.mrb[0].mxu1 }
 0x398   :  { %v251_v53 = vadd.f32 %v3783_v51, %v250_v52  ;;  %v3049_v54 = vpop.f32.mrb[1].mxu1 }
 0x39a   :  { %v338_v55 = vadd.f32 %v335_v47, %v251_v53 }
 0x39c   :  { %v2826_v56 = vmul.f32 -1.442695, %v338_v55 }
 0x39e   :  { %3496 = vpow2.f32 %v2826_v56 }
 0x39f   :  { %v456_v57 = vpop.f32.mrb[2].mxu1 }
 0x3a0   :  { %v457_v58 = vadd.f32 %v3697_v11, %v456_v57  ;;  %v3071_v59 = vpop.f32.mrb[3].mxu1 }
 0x3a2   :  { %470 = vrot.lane.b32.xlu0 %v457_v58, %s3589_s16  ;;  %v462_v3 = vadd.f32 %v2829_v2, %v457_v58  ;;  %v2838_v58 = vld [vmem:[%s4150_s0 + $0x10] sm:$0xff] }
 0x3a4   :  { %v2830_v6 = vmul.f32 -1.442695, %v462_v3 }
 0x3a8   :  { %v3497_v60 = vpop.eup %3496 }
 0x3a9   :  { %v342_v61 = vadd.f32 1.0, %v3497_v60 }
 0x3ab   :  { %3498 = vrcp.f32 %v342_v61 }
 0x3ac   :  { %3500 = vpow2.f32 %v2830_v6 }
 0x3b5   :  { %v3499_v63 = vpop.eup %3498 }
 0x3b6   :  { %v349_v1 = vmul.f32 %v3499_v63, %v347_v62  ;;  %v3501_v7 = vpop.eup %3500  ;;  %v356_v21 = vsub.f32 1.0, %v3499_v63 }
 0x3b7   :  { %v466_v8 = vadd.f32 1.0, %v3501_v7 }
 0x3b8   :  { %351 = vrot.lane.b32.xlu1 %v349_v1, %s3589_s16 }
 0x3b9   :  { %3502 = vrcp.f32 %v466_v8 }
 0x3c3   :  { %v3503_v10 = vpop.eup %3502 }
 0x3c4   :  { %v480_v27 = vsub.f32 1.0, %v3503_v10 }
 0x414   :  { %v471_v12 = vpop.permute.xlu0 %470 }
 0x415   :  { %v473_v13 = vmul.f32 %v3503_v10, %v471_v12 }
 0x417   :  { %475 = vrot.lane.b32.xlu0 %v473_v13, %s3589_s16 }
 0x41b   :  { %362 = vrot.lane.b32.xlu0 %v3743_v38, %s3591_s18 }
 0x41f   :  { %486 = vrot.lane.b32.xlu0 %v374_v50, %s3591_s18 }
 0x42a   :  { %v352_v14 = vpop.permute.xlu1 %351 }
 0x42b   :  { %v354_v15 = vadd.f32 %v352_v14, %v251_v53 }
 0x42d   :  { %3504 = vtanh.f32 %v354_v15 }
 0x437   :  { %v3505_v16 = vpop.eup %3504 }
 0x438   :  { %358 = vrot.lane.b32.xlu1 %v3505_v16, %s3590_s17 }
 0x489   :  { %v476_v17 = vpop.permute.xlu0 %475 }
 0x48a   :  { %v478_v18 = vadd.f32 %v2829_v2, %v476_v17 }
 0x48c   :  { %3506 = vtanh.f32 %v478_v18 }
 0x48d   :  { %v363_v20 = vpop.permute.xlu0 %362 }
 0x48e   :  { %v365_v23 = vmul.f32 %v3499_v63, %v363_v20 }
 0x491   :  { %v487_v26 = vpop.permute.xlu0 %486 }
 0x492   :  { %v489_v30 = vmul.f32 %v3503_v10, %v487_v26 }
 0x496   :  { %v3507_v19 = vpop.eup %3506 }
 0x497   :  { %482 = vrot.lane.b32.xlu1 %v3507_v19, %s3590_s17 }
 0x4aa   :  { %v359_v22 = vpop.permute.xlu1 %358 }
 0x4ab   :  { %v361_v24 = vmul.f32 %v359_v22, %v356_v21 }
 0x4ad   :  { %v366_v25 = vadd.f32 %v365_v23, %v361_v24 }
 0x4af   :  { %370 = vrot.lane.b32.xlu1 %v366_v25, %s3590_s17 }
 0x509   :  { %v483_v29 = vpop.permute.xlu1 %482 }
 0x50a   :  { %v485_v31 = vmul.f32 %v483_v29, %v480_v27 }
 0x50c   :  { %v490_v33 = vadd.f32 %v489_v30, %v485_v31 }
 0x50e   :  { %503 = vrot.lane.b32.xlu0 %v490_v33, %s3590_s17 }
 0x521   :  { %v371_v34 = vpop.permute.xlu1 %370 }
 0x522   :  { %373 = vst.msk [vmem:[#allocation3] sm:$0xff] %vm46_vm0, %v371_v34 }
 0x529   :  { %v375_v35 = vld [vmem:[#allocation3] sm:$0xff] }
 0x52a   :  { %3092 = vmatmul.mubr.msk.f32.vlgmr.msra.gmra.mrb[4].mxu1 %vm46_vm0, %v375_v35 }
 0x52b   :  { %3366 = vmatpush3.bf16.msra.mxu1 %v3725_v32  ;;  %3113 = vmatprep.mubr.msk.f32.mxu1 %vm3587_vm1, %v3588_v4 }
 0x52c   :  { %3367 = vmatprep.subr.bf16.mxu1 %v3586_v0 }
 0x52f   :  { %3369 = vmatpush3.bf16.msra.mxu1 %v3739_v37 }
 0x530   :  { %3376 = vmatprep.subr.bf16.mxu1 %v3586_v0 }
 0x580   :  { %v504_v38 = vpop.permute.xlu0 %503 }
 0x581   :  { %691 = vst.msk [vmem:[#allocation2] sm:$0xff] %vm46_vm0, %v504_v38  ;;  %3081 = vmatmul.mubr.msk.f32.vlgmr.msra.gmra.mrb[4].mxu0 %vm46_vm0, %v504_v38 }
 0x582   :  { %3360 = vmatpush3.bf16.msra.mxu0 %v3669_v5  ;;  %3102 = vmatprep.mubr.msk.f32.mxu0 %vm3587_vm1, %v3588_v4 }
 0x583   :  { %3361 = vmatprep.subr.bf16.mxu0 %v3586_v0 }
 0x586   :  { %3363 = vmatpush3.bf16.msra.mxu0 %v3686_v9 }
 0x587   :  { %3370 = vmatprep.subr.bf16.mxu0 %v3586_v0 }
 0x588   :  { %v697_v39 = vld [vmem:[#allocation2] sm:$0xff] }
 0x589   :  { %3103 = vmatmul.mubr.msk.f32.vlgmr.msra.gmra.mrb[6].mxu0 %vm46_vm0, %v697_v39 }
 0x58a   :  { %3372 = vmatpush3.bf16.msra.mxu0 %v3714_v28  ;;  %3124 = vmatprep.mubr.msk.f32.mxu0 %vm3587_vm1, %v3588_v4 }
 0x58b   :  { %3373 = vmatprep.subr.bf16.mxu0 %v3586_v0 }
 0x58e   :  { %3375 = vmatpush3.bf16.msra.mxu0 %v3734_v36 }
 0x58f   :  { %3382 = vmatprep.subr.bf16.mxu0 %v3586_v0 }
 0x5fd   :  { %v657_v40 = vpop.f32.mrb[4].mxu1 }
 0x5fe   :  { %v658_v41 = vadd.f32 %v3761_v45, %v657_v40  ;;  %v3093_v42 = vpop.f32.mrb[5].mxu1 }
 0x600   :  { %669 = vrot.lane.b32.xlu1 %v658_v41, %s3589_s16 }
 0x654   :  { %v573_v43 = vpop.f32.mrb[4].mxu0 }
 0x655   :  { %v574_v44 = vadd.f32 %v3783_v51, %v573_v43  ;;  %v3082_v46 = vpop.f32.mrb[5].mxu0 }
 0x657   :  { %v661_v47 = vadd.f32 %v658_v41, %v574_v44 }
 0x659   :  { %v2835_v48 = vmul.f32 -1.442695, %v661_v47 }
 0x65b   :  { %3508 = vpow2.f32 %v2835_v48 }
 0x65c   :  { %v779_v49 = vpop.f32.mrb[6].mxu0 }
 0x65d   :  { %v780_v50 = vadd.f32 %v3697_v11, %v779_v49  ;;  %v3104_v52 = vpop.f32.mrb[7].mxu0 }
 0x65f   :  { %793 = vrot.lane.b32.xlu0 %v780_v50, %s3589_s16  ;;  %v785_v59 = vadd.f32 %v2838_v58, %v780_v50  ;;  %v2847_v50 = vld [vmem:[%s4150_s0 + $0x18] sm:$0xff] }
 0x661   :  { %v2839_v60 = vmul.f32 -1.442695, %v785_v59 }
 0x665   :  { %v3509_v53 = vpop.eup %3508 }
 0x666   :  { %v665_v54 = vadd.f32 1.0, %v3509_v53 }
 0x668   :  { %3510 = vrcp.f32 %v665_v54 }
 0x669   :  { %3512 = vpow2.f32 %v2839_v60 }
 0x672   :  { %v3511_v55 = vpop.eup %3510  ;;  %v670_v56 = vpop.permute.xlu1 %669 }
 0x673   :  { %v672_v57 = vmul.f32 %v3511_v55, %v670_v56  ;;  %v3513_v61 = vpop.eup %3512  ;;  %v679_v14 = vsub.f32 1.0, %v3511_v55 }
 0x674   :  { %v789_v62 = vadd.f32 1.0, %v3513_v61 }
 0x675   :  { %674 = vrot.lane.b32.xlu1 %v672_v57, %s3589_s16 }
 0x676   :  { %3514 = vrcp.f32 %v789_v62 }
 0x680   :  { %v3515_v63 = vpop.eup %3514 }
 0x681   :  { %v803_v20 = vsub.f32 1.0, %v3515_v63 }
 0x6d1   :  { %v794_v1 = vpop.permute.xlu0 %793 }
 0x6d2   :  { %v796_v2 = vmul.f32 %v3515_v63, %v794_v1 }
 0x6d4   :  { %798 = vrot.lane.b32.xlu0 %v796_v2, %s3589_s16 }
 0x6d8   :  { %685 = vrot.lane.b32.xlu0 %v375_v35, %s3591_s18 }
 0x6dc   :  { %809 = vrot.lane.b32.xlu0 %v697_v39, %s3591_s18 }
 0x6e7   :  { %v675_v3 = vpop.permute.xlu1 %674 }
 0x6e8   :  { %v677_v6 = vadd.f32 %v675_v3, %v574_v44 }
 0x6ea   :  { %3516 = vtanh.f32 %v677_v6 }
 0x6f4   :  { %v3517_v7 = vpop.eup %3516 }
 0x6f5   :  { %681 = vrot.lane.b32.xlu1 %v3517_v7, %s3590_s17 }
 0x746   :  { %v799_v8 = vpop.permute.xlu0 %798 }
 0x747   :  { %v801_v10 = vadd.f32 %v2838_v58, %v799_v8 }
 0x749   :  { %3518 = vtanh.f32 %v801_v10 }
 0x74a   :  { %v686_v13 = vpop.permute.xlu0 %685 }
 0x74b   :  { %v688_v16 = vmul.f32 %v3511_v55, %v686_v13 }
 0x74e   :  { %v810_v19 = vpop.permute.xlu0 %809 }
 0x74f   :  { %v812_v22 = vmul.f32 %v3515_v63, %v810_v19 }
 0x753   :  { %v3519_v12 = vpop.eup %3518 }
 0x754   :  { %805 = vrot.lane.b32.xlu1 %v3519_v12, %s3590_s17 }
 0x767   :  { %v682_v15 = vpop.permute.xlu1 %681 }
 0x768   :  { %v684_v17 = vmul.f32 %v682_v15, %v679_v14 }
 0x76a   :  { %v689_v18 = vadd.f32 %v688_v16, %v684_v17 }
 0x76c   :  { %693 = vrot.lane.b32.xlu1 %v689_v18, %s3590_s17 }
 0x7c6   :  { %v806_v21 = vpop.permute.xlu1 %805 }
 0x7c7   :  { %v808_v23 = vmul.f32 %v806_v21, %v803_v20 }
 0x7c9   :  { %v813_v24 = vadd.f32 %v812_v22, %v808_v23 }
 0x7cb   :  { %826 = vrot.lane.b32.xlu0 %v813_v24, %s3590_s17 }
 0x7de   :  { %v694_v25 = vpop.permute.xlu1 %693 }
 0x7df   :  { %696 = vst.msk [vmem:[#allocation3] sm:$0xff] %vm46_vm0, %v694_v25 }
 0x7e6   :  { %v698_v26 = vld [vmem:[#allocation3] sm:$0xff] }
 0x7e7   :  { %3125 = vmatmul.mubr.msk.f32.vlgmr.msra.gmra.mrb[8].mxu0 %vm46_vm0, %v698_v26 }
 0x7e8   :  { %3384 = vmatpush3.bf16.msra.mxu0 %v3725_v32  ;;  %3146 = vmatprep.mubr.msk.f32.mxu0 %vm3587_vm1, %v3588_v4 }
 0x7e9   :  { %3385 = vmatprep.subr.bf16.mxu0 %v3586_v0 }
 0x7ec   :  { %3387 = vmatpush3.bf16.msra.mxu0 %v3739_v37 }
 0x7ed   :  { %3394 = vmatprep.subr.bf16.mxu0 %v3586_v0 }
 0x83d   :  { %v827_v27 = vpop.permute.xlu0 %826 }
 0x83e   :  { %1014 = vst.msk [vmem:[#allocation2] sm:$0xff] %vm46_vm0, %v827_v27  ;;  %3114 = vmatmul.mubr.msk.f32.vlgmr.msra.gmra.mrb[6].mxu1 %vm46_vm0, %v827_v27 }
 0x83f   :  { %3378 = vmatpush3.bf16.msra.mxu1 %v3669_v5  ;;  %3135 = vmatprep.mubr.msk.f32.mxu1 %vm3587_vm1, %v3588_v4 }
 0x840   :  { %3379 = vmatprep.subr.bf16.mxu1 %v3586_v0 }
 0x843   :  { %3381 = vmatpush3.bf16.msra.mxu1 %v3686_v9 }
 0x844   :  { %3388 = vmatprep.subr.bf16.mxu1 %v3586_v0 }
 0x845   :  { %v1020_v29 = vld [vmem:[#allocation2] sm:$0xff] }
 0x846   :  { %3136 = vmatmul.mubr.msk.f32.vlgmr.msra.gmra.mrb[8].mxu1 %vm46_vm0, %v1020_v29 }
 0x847   :  { %3390 = vmatpush3.bf16.msra.mxu1 %v3714_v28  ;;  %3157 = vmatprep.mubr.msk.f32.mxu1 %vm3587_vm1, %v3588_v4 }
 0x848   :  { %3391 = vmatprep.subr.bf16.mxu1 %v3586_v0 }
 0x84b   :  { %3393 = vmatpush3.bf16.msra.mxu1 %v3734_v36 }
 0x84c   :  { %3400 = vmatprep.subr.bf16.mxu1 %v3586_v0 }
 0x8ba   :  { %v980_v30 = vpop.f32.mrb[8].mxu0 }
 0x8bb   :  { %v981_v31 = vadd.f32 %v3761_v45, %v980_v30  ;;  %v3126_v33 = vpop.f32.mrb[9].mxu0 }
 0x8bd   :  { %992 = vrot.lane.b32.xlu1 %v981_v31, %s3589_s16 }
 0x911   :  { %v896_v34 = vpop.f32.mrb[6].mxu1 }
 0x912   :  { %v897_v35 = vadd.f32 %v3783_v51, %v896_v34  ;;  %v3115_v38 = vpop.f32.mrb[7].mxu1 }
 0x914   :  { %v984_v39 = vadd.f32 %v981_v31, %v897_v35 }
 0x916   :  { %v2844_v40 = vmul.f32 -1.442695, %v984_v39 }
 0x918   :  { %3520 = vpow2.f32 %v2844_v40 }
 0x919   :  { %v1102_v41 = vpop.f32.mrb[8].mxu1 }
 0x91a   :  { %v1103_v42 = vadd.f32 %v3697_v11, %v1102_v41  ;;  %v3137_v43 = vpop.f32.mrb[9].mxu1 }
 0x91c   :  { %1116 = vrot.lane.b32.xlu0 %v1103_v42, %s3589_s16  ;;  %v1108_v52 = vadd.f32 %v2847_v50, %v1103_v42  ;;  %v2856_v42 = vld [vmem:[%s4150_s0 + $0x20] sm:$0xff] }
 0x91e   :  { %v2848_v53 = vmul.f32 -1.442695, %v1108_v52 }
 0x922   :  { %v3521_v44 = vpop.eup %3520 }
 0x923   :  { %v988_v46 = vadd.f32 1.0, %v3521_v44 }
 0x925   :  { %3522 = vrcp.f32 %v988_v46 }
 0x926   :  { %3524 = vpow2.f32 %v2848_v53 }
 0x92f   :  { %v3523_v47 = vpop.eup %3522  ;;  %v993_v48 = vpop.permute.xlu1 %992 }
 0x930   :  { %v995_v49 = vmul.f32 %v3523_v47, %v993_v48  ;;  %v3525_v54 = vpop.eup %3524  ;;  %v1002_v3 = vsub.f32 1.0, %v3523_v47 }
 0x931   :  { %v1112_v55 = vadd.f32 1.0, %v3525_v54 }
 0x932   :  { %997 = vrot.lane.b32.xlu1 %v995_v49, %s3589_s16 }
 0x933   :  { %3526 = vrcp.f32 %v1112_v55 }
 0x93d   :  { %v3527_v56 = vpop.eup %3526 }
 0x93e   :  { %v1126_v13 = vsub.f32 1.0, %v3527_v56 }
 0x98e   :  { %v1117_v57 = vpop.permute.xlu0 %1116 }
 0x98f   :  { %v1119_v58 = vmul.f32 %v3527_v56, %v1117_v57 }
 0x991   :  { %1121 = vrot.lane.b32.xlu0 %v1119_v58, %s3589_s16 }
 0x995   :  { %1008 = vrot.lane.b32.xlu0 %v698_v26, %s3591_s18 }
 0x999   :  { %1132 = vrot.lane.b32.xlu0 %v1020_v29, %s3591_s18 }
 0x9a4   :  { %v998_v59 = vpop.permute.xlu1 %997 }
 0x9a5   :  { %v1000_v60 = vadd.f32 %v998_v59, %v897_v35 }
 0x9a7   :  { %3528 = vtanh.f32 %v1000_v60 }
 0x9b1   :  { %v3529_v61 = vpop.eup %3528 }
 0x9b2   :  { %1004 = vrot.lane.b32.xlu1 %v3529_v61, %s3590_s17 }
 0xa03   :  { %v1122_v62 = vpop.permute.xlu0 %1121 }
 0xa04   :  { %v1124_v63 = vadd.f32 %v2847_v50, %v1122_v62 }
 0xa06   :  { %3530 = vtanh.f32 %v1124_v63 }
 0xa07   :  { %v1009_v2 = vpop.permute.xlu0 %1008 }
 0xa08   :  { %v1011_v7 = vmul.f32 %v3523_v47, %v1009_v2 }
 0xa0b   :  { %v1133_v12 = vpop.permute.xlu0 %1132 }
 0xa0c   :  { %v1135_v15 = vmul.f32 %v3527_v56, %v1133_v12 }
 0xa10   :  { %v3531_v1 = vpop.eup %3530 }
 0xa11   :  { %1128 = vrot.lane.b32.xlu1 %v3531_v1, %s3590_s17 }
 0xa24   :  { %v1005_v6 = vpop.permute.xlu1 %1004 }
 0xa25   :  { %v1007_v8 = vmul.f32 %v1005_v6, %v1002_v3 }
 0xa27   :  { %v1012_v10 = vadd.f32 %v1011_v7, %v1007_v8 }
 0xa29   :  { %1016 = vrot.lane.b32.xlu1 %v1012_v10, %s3590_s17 }
 0xa83   :  { %v1129_v14 = vpop.permute.xlu1 %1128 }
 0xa84   :  { %v1131_v16 = vmul.f32 %v1129_v14, %v1126_v13 }
 0xa86   :  { %v1136_v17 = vadd.f32 %v1135_v15, %v1131_v16 }
 0xa88   :  { %1149 = vrot.lane.b32.xlu0 %v1136_v17, %s3590_s17 }
 0xa9b   :  { %v1017_v18 = vpop.permute.xlu1 %1016 }
 0xa9c   :  { %1019 = vst.msk [vmem:[#allocation3] sm:$0xff] %vm46_vm0, %v1017_v18 }
 0xaa3   :  { %v1021_v19 = vld [vmem:[#allocation3] sm:$0xff] }
 0xaa4   :  { %3158 = vmatmul.mubr.msk.f32.vlgmr.msra.gmra.mrb[10].mxu1 %vm46_vm0, %v1021_v19 }
 0xaa5   :  { %3402 = vmatpush3.bf16.msra.mxu1 %v3725_v32  ;;  %3179 = vmatprep.mubr.msk.f32.mxu1 %vm3587_vm1, %v3588_v4 }
 0xaa6   :  { %3403 = vmatprep.subr.bf16.mxu1 %v3586_v0 }
 0xaa9   :  { %3405 = vmatpush3.bf16.msra.mxu1 %v3739_v37 }
 0xaaa   :  { %3412 = vmatprep.subr.bf16.mxu1 %v3586_v0 }
 0xafa   :  { %v1150_v20 = vpop.permute.xlu0 %1149 }
 0xafb   :  { %1337 = vst.msk [vmem:[#allocation2] sm:$0xff] %vm46_vm0, %v1150_v20  ;;  %3147 = vmatmul.mubr.msk.f32.vlgmr.msra.gmra.mrb[10].mxu0 %vm46_vm0, %v1150_v20 }
 0xafc   :  { %3396 = vmatpush3.bf16.msra.mxu0 %v3669_v5  ;;  %3168 = vmatprep.mubr.msk.f32.mxu0 %vm3587_vm1, %v3588_v4 }
 0xafd   :  { %3397 = vmatprep.subr.bf16.mxu0 %v3586_v0 }
 0xb00   :  { %3399 = vmatpush3.bf16.msra.mxu0 %v3686_v9 }
 0xb01   :  { %3406 = vmatprep.subr.bf16.mxu0 %v3586_v0 }
 0xb02   :  { %v1343_v21 = vld [vmem:[#allocation2] sm:$0xff] }
 0xb03   :  { %3169 = vmatmul.mubr.msk.f32.vlgmr.msra.gmra.mrb[12].mxu0 %vm46_vm0, %v1343_v21 }
 0xb04   :  { %3408 = vmatpush3.bf16.msra.mxu0 %v3714_v28  ;;  %3190 = vmatprep.mubr.msk.f32.mxu0 %vm3587_vm1, %v3588_v4 }
 0xb05   :  { %3409 = vmatprep.subr.bf16.mxu0 %v3586_v0 }
 0xb08   :  { %3411 = vmatpush3.bf16.msra.mxu0 %v3734_v36 }
 0xb09   :  { %3418 = vmatprep.subr.bf16.mxu0 %v3586_v0 }
 0xb77   :  { %v1303_v22 = vpop.f32.mrb[10].mxu1 }
 0xb78   :  { %v1304_v23 = vadd.f32 %v3761_v45, %v1303_v22  ;;  %v3159_v24 = vpop.f32.mrb[11].mxu1 }
 0xb7a   :  { %1315 = vrot.lane.b32.xlu1 %v1304_v23, %s3589_s16 }
 0xbce   :  { %v1219_v25 = vpop.f32.mrb[10].mxu0 }
 0xbcf   :  { %v1220_v26 = vadd.f32 %v3783_v51, %v1219_v25  ;;  %v3148_v27 = vpop.f32.mrb[11].mxu0  ;;  %v2865_v25 = vld [vmem:[%s4150_s0 + $0x28] sm:$0xff] }
 0xbd1   :  { %v1307_v29 = vadd.f32 %v1304_v23, %v1220_v26 }
 0xbd3   :  { %v2853_v30 = vmul.f32 -1.442695, %v1307_v29 }
 0xbd5   :  { %3532 = vpow2.f32 %v2853_v30 }
 0xbd6   :  { %v1425_v31 = vpop.f32.mrb[12].mxu0 }
 0xbd7   :  { %v1426_v33 = vadd.f32 %v3697_v11, %v1425_v31  ;;  %v3170_v34 = vpop.f32.mrb[13].mxu0 }
 0xbd9   :  { %1439 = vrot.lane.b32.xlu0 %v1426_v33, %s3589_s16  ;;  %v1431_v43 = vadd.f32 %v2856_v42, %v1426_v33 }
 0xbdb   :  { %v2857_v44 = vmul.f32 -1.442695, %v1431_v43 }
 0xbdf   :  { %v3533_v35 = vpop.eup %3532 }
 0xbe0   :  { %v1311_v38 = vadd.f32 1.0, %v3533_v35 }
 0xbe2   :  { %3534 = vrcp.f32 %v1311_v38 }
 0xbe3   :  { %3536 = vpow2.f32 %v2857_v44 }
 0xbec   :  { %v3535_v39 = vpop.eup %3534  ;;  %v1316_v40 = vpop.permute.xlu1 %1315 }
 0xbed   :  { %v1318_v41 = vmul.f32 %v3535_v39, %v1316_v40  ;;  %v3537_v46 = vpop.eup %3536  ;;  %v1325_v59 = vsub.f32 1.0, %v3535_v39 }
 0xbee   :  { %v1435_v47 = vadd.f32 1.0, %v3537_v46 }
 0xbef   :  { %1320 = vrot.lane.b32.xlu1 %v1318_v41, %s3589_s16 }
 0xbf0   :  { %3538 = vrcp.f32 %v1435_v47 }
 0xbfa   :  { %v3539_v48 = vpop.eup %3538 }
 0xbfb   :  { %v1449_v2 = vsub.f32 1.0, %v3539_v48 }
 0xc4b   :  { %v1440_v49 = vpop.permute.xlu0 %1439 }
 0xc4c   :  { %v1442_v50 = vmul.f32 %v3539_v48, %v1440_v49 }
 0xc4e   :  { %1444 = vrot.lane.b32.xlu0 %v1442_v50, %s3589_s16 }
 0xc52   :  { %1331 = vrot.lane.b32.xlu0 %v1021_v19, %s3591_s18 }
 0xc56   :  { %1455 = vrot.lane.b32.xlu0 %v1343_v21, %s3591_s18 }
 0xc61   :  { %v1321_v52 = vpop.permute.xlu1 %1320 }
 0xc62   :  { %v1323_v53 = vadd.f32 %v1321_v52, %v1220_v26 }
 0xc64   :  { %3540 = vtanh.f32 %v1323_v53 }
 0xc6e   :  { %v3541_v54 = vpop.eup %3540 }
 0xc6f   :  { %1327 = vrot.lane.b32.xlu1 %v3541_v54, %s3590_s17 }
 0xcc0   :  { %v1445_v55 = vpop.permute.xlu0 %1444 }
 0xcc1   :  { %v1447_v56 = vadd.f32 %v2856_v42, %v1445_v55 }
 0xcc3   :  { %3542 = vtanh.f32 %v1447_v56 }
 0xcc4   :  { %v1332_v58 = vpop.permute.xlu0 %1331 }
 0xcc5   :  { %v1334_v61 = vmul.f32 %v3535_v39, %v1332_v58  ;;  %v1991_v58 = vld [vmem:[%s4147_s2] sm:$0xff] }
 0xcc8   :  { %v1456_v1 = vpop.permute.xlu0 %1455 }
 0xcc9   :  { %v1458_v6 = vmul.f32 %v3539_v48, %v1456_v1 }
 0xccd   :  { %v3543_v57 = vpop.eup %3542 }
 0xcce   :  { %1451 = vrot.lane.b32.xlu1 %v3543_v57, %s3590_s17 }
 0xce1   :  { %v1328_v60 = vpop.permute.xlu1 %1327 }
 0xce2   :  { %v1330_v62 = vmul.f32 %v1328_v60, %v1325_v59  ;;  %v1992_v59 = vld [vmem:[%s4147_s2 + $0x8] sm:$0xff] }
 0xce3   :  { %v3966_v60 = vpack.c.bf16 %v1992_v59, %v1991_v58 }
 0xce4   :  { %v1335_v63 = vadd.f32 %v1334_v61, %v1330_v62  ;;  %v1993_v61 = vld [vmem:[%s4147_s2 + $0x10] sm:$0xff]  ;;  %v1994_v62 = vld [vmem:[%s4147_s2 + $0x18] sm:$0xff] }
 0xce5   :  { %v3977_v1 = vpack.c.bf16 %v1994_v62, %v1993_v61 }
 0xce6   :  { %1339 = vrot.lane.b32.xlu1 %v1335_v63, %s3590_s17 }
 0xd40   :  { %v1452_v3 = vpop.permute.xlu1 %1451 }
 0xd41   :  { %v1454_v7 = vmul.f32 %v1452_v3, %v1449_v2 }
 0xd43   :  { %v1459_v8 = vadd.f32 %v1458_v6, %v1454_v7 }
 0xd45   :  { %1472 = vrot.lane.b32.xlu0 %v1459_v8, %s3590_s17 }
 0xd58   :  { %v1340_v10 = vpop.permute.xlu1 %1339 }
 0xd59   :  { %1342 = vst.msk [vmem:[#allocation3] sm:$0xff] %vm46_vm0, %v1340_v10 }
 0xd60   :  { %v1344_v12 = vld [vmem:[#allocation3] sm:$0xff] }
 0xd61   :  { %3191 = vmatmul.mubr.msk.f32.vlgmr.msra.gmra.mrb[14].mxu0 %vm46_vm0, %v1344_v12 }
 0xd62   :  { %3420 = vmatpush3.bf16.msra.mxu0 %v3725_v32  ;;  %3212 = vmatprep.mubr.msk.f32.mxu0 %vm3587_vm1, %v3588_v4 }
 0xd63   :  { %3421 = vmatprep.subr.bf16.mxu0 %v3586_v0 }
 0xd66   :  { %3423 = vmatpush3.bf16.msra.mxu0 %v3739_v37 }
 0xd67   :  { %3430 = vmatprep.subr.bf16.mxu0 %v3586_v0 }
 0xdb7   :  { %v1473_v13 = vpop.permute.xlu0 %1472 }
 0xdb8   :  { %1660 = vst.msk [vmem:[#allocation2] sm:$0xff] %vm46_vm0, %v1473_v13  ;;  %3180 = vmatmul.mubr.msk.f32.vlgmr.msra.gmra.mrb[12].mxu1 %vm46_vm0, %v1473_v13 }
 0xdb9   :  { %3414 = vmatpush3.bf16.msra.mxu1 %v3669_v5  ;;  %3201 = vmatprep.mubr.msk.f32.mxu1 %vm3587_vm1, %v3588_v4 }
 0xdba   :  { %3415 = vmatprep.subr.bf16.mxu1 %v3586_v0 }
 0xdbd   :  { %3417 = vmatpush3.bf16.msra.mxu1 %v3686_v9 }
 0xdbe   :  { %3424 = vmatprep.subr.bf16.mxu1 %v3586_v0 }
 0xdbf   :  { %v1666_v32 = vld [vmem:[#allocation2] sm:$0xff] }
 0xdc0   :  { %3202 = vmatmul.mubr.msk.f32.vlgmr.msra.gmra.mrb[14].mxu1 %vm46_vm0, %v1666_v32 }
 0xdc1   :  { %3426 = vmatpush3.bf16.msra.mxu1 %v3714_v28  ;;  %3223 = vmatprep.mubr.msk.f32.mxu1 %vm3587_vm1, %v3588_v4 }
 0xdc2   :  { %3427 = vmatprep.subr.bf16.mxu1 %v3586_v0 }
 0xdc5   :  { %3429 = vmatpush3.bf16.msra.mxu1 %v3734_v36 }
 0xdc6   :  { %3436 = vmatprep.subr.bf16.mxu1 %v3586_v0 }
 0xe34   :  { %v1626_v5 = vpop.f32.mrb[14].mxu0 }
 0xe35   :  { %v1627_v37 = vadd.f32 %v3761_v45, %v1626_v5  ;;  %v3192_v9 = vpop.f32.mrb[15].mxu0  ;;  %v3993_v5 = vld [vmem:[%s4149_s3] ss:$0 sm:$0xff] }
 0xe37   :  { %1638 = vrot.lane.b32.xlu1 %v1627_v37, %s3589_s16 }
 0xe8b   :  { %v1542_v14 = vpop.f32.mrb[12].mxu1 }
 0xe8c   :  { %v1543_v15 = vadd.f32 %v3783_v51, %v1542_v14  ;;  %v3181_v16 = vpop.f32.mrb[13].mxu1 }
 0xe8e   :  { %v1630_v28 = vadd.f32 %v1627_v37, %v1543_v15 }
 0xe90   :  { %v2862_v17 = vmul.f32 -1.442695, %v1630_v28 }
 0xe92   :  { %3544 = vpow2.f32 %v2862_v17  ;;  %v2874_v17 = vld [vmem:[%s4150_s0 + $0x30] sm:$0xff] }
 0xe93   :  { %v1748_v18 = vpop.f32.mrb[14].mxu1 }
 0xe94   :  { %v1749_v19 = vadd.f32 %v3697_v11, %v1748_v18  ;;  %v3203_v20 = vpop.f32.mrb[15].mxu1 }
 0xe96   :  { %1762 = vrot.lane.b32.xlu0 %v1749_v19, %s3589_s16  ;;  %v1754_v26 = vadd.f32 %v2865_v25, %v1749_v19 }
 0xe98   :  { %v2866_v27 = vmul.f32 -1.442695, %v1754_v26 }
 0xe9c   :  { %v3545_v36 = vpop.eup %3544 }
 0xe9d   :  { %v1634_v21 = vadd.f32 1.0, %v3545_v36 }
 0xe9f   :  { %3546 = vrcp.f32 %v1634_v21 }
 0xea0   :  { %3548 = vpow2.f32 %v2866_v27 }
 0xea9   :  { %v3547_v22 = vpop.eup %3546  ;;  %v1639_v23 = vpop.permute.xlu1 %1638 }
 0xeaa   :  { %v1641_v24 = vmul.f32 %v3547_v22, %v1639_v23  ;;  %v3549_v29 = vpop.eup %3548  ;;  %v1648_v43 = vsub.f32 1.0, %v3547_v22 }
 0xeab   :  { %v1758_v11 = vadd.f32 1.0, %v3549_v29 }
 0xeac   :  { %1643 = vrot.lane.b32.xlu1 %v1641_v24, %s3589_s16 }
 0xead   :  { %3550 = vrcp.f32 %v1758_v11 }
 0xeb7   :  { %v3551_v30 = vpop.eup %3550 }
 0xeb8   :  { %v1772_v50 = vsub.f32 1.0, %v3551_v30 }
 0xf08   :  { %v1763_v31 = vpop.permute.xlu0 %1762 }
 0xf09   :  { %v1765_v33 = vmul.f32 %v3551_v30, %v1763_v31  ;;  %v2193_v31 = vld [vmem:[%s4151_s6 + $0x8] sm:$0xff] }
 0xf0b   :  { %1767 = vrot.lane.b32.xlu0 %v1765_v33, %s3589_s16 }
 0xf0f   :  { %1654 = vrot.lane.b32.xlu0 %v1344_v12, %s3591_s18 }
 0xf13   :  { %1778 = vrot.lane.b32.xlu0 %v1666_v32, %s3591_s18 }
 0xf1e   :  { %v1644_v34 = vpop.permute.xlu1 %1643 }
 0xf1f   :  { %v1646_v35 = vadd.f32 %v1644_v34, %v1543_v15  ;;  %v2194_v34 = vld [vmem:[%s4151_s6 + $0x10] sm:$0xff] }
 0xf21   :  { %3552 = vtanh.f32 %v1646_v35  ;;  %v2195_v35 = vld [vmem:[%s4151_s6 + $0x18] sm:$0xff] }
 0xf2b   :  { %v3553_v38 = vpop.eup %3552 }
 0xf2c   :  { %1650 = vrot.lane.b32.xlu1 %v3553_v38, %s3590_s17  ;;  %v3446_v38 = vpack.c.bf16 %v2195_v35, %v2194_v34 }
 0xf7d   :  { %v1768_v39 = vpop.permute.xlu0 %1767 }
 0xf7e   :  { %v1770_v40 = vadd.f32 %v2865_v25, %v1768_v39 }
 0xf80   :  { %3554 = vtanh.f32 %v1770_v40 }
 0xf81   :  { %v1655_v42 = vpop.permute.xlu0 %1654 }
 0xf82   :  { %v1657_v46 = vmul.f32 %v3547_v22, %v1655_v42  ;;  %v2106_v42 = vld [vmem:[%s4152_s4] sm:$0xff] }
 0xf85   :  { %v1779_v49 = vpop.permute.xlu0 %1778 }
 0xf86   :  { %v1781_v53 = vmul.f32 %v3551_v30, %v1779_v49  ;;  %v2192_v30 = vld [vmem:[%s4151_s6] sm:$0xff]  ;;  %v2109_v49 = vld [vmem:[%s4152_s4 + $0x18] sm:$0xff] }
 0xf87   :  { %v3443_v33 = vpack.c.bf16 %v2193_v31, %v2192_v30 }
 0xf8a   :  { %v3555_v41 = vpop.eup %3554 }
 0xf8b   :  { %1774 = vrot.lane.b32.xlu1 %v3555_v41, %s3590_s17 }
 0xf9e   :  { %v1651_v44 = vpop.permute.xlu1 %1650 }
 0xf9f   :  { %v1653_v47 = vmul.f32 %v1651_v44, %v1648_v43  ;;  %v2107_v43 = vld [vmem:[%s4152_s4 + $0x8] sm:$0xff]  ;;  %v2108_v44 = vld [vmem:[%s4152_s4 + $0x10] sm:$0xff] }
 0xfa1   :  { %v1658_v48 = vadd.f32 %v1657_v46, %v1653_v47 }
 0xfa3   :  { %1662 = vrot.lane.b32.xlu1 %v1658_v48, %s3590_s17  ;;  %v3437_v48 = vpack.c.bf16 %v2107_v43, %v2106_v42 }
 0xffd   :  { %v1775_v52 = vpop.permute.xlu1 %1774 }
 0xffe   :  { %v1777_v54 = vmul.f32 %v1775_v52, %v1772_v50  ;;  %v3440_v52 = vpack.c.bf16 %v2109_v49, %v2108_v44 }
0x1000   :  { %v1782_v55 = vadd.f32 %v1781_v53, %v1777_v54 }
0x1002   :  { %1795 = vrot.lane.b32.xlu0 %v1782_v55, %s3590_s17 }
0x1015   :  { %v1663_v56 = vpop.permute.xlu1 %1662 }
0x1016   :  { %1665 = vst.msk [vmem:[#allocation3] sm:$0xff] %vm46_vm0, %v1663_v56 }
0x101d   :  { %v1667_v57 = vld [vmem:[#allocation3] sm:$0xff] }
0x101e   :  { %3224 = vmatmul.mubr.msk.f32.vlgmr.msra.gmra.mrb[16].mxu1 %vm46_vm0, %v1667_v57 }
0x101f   :  { %3245 = vmatprep.mubr.msk.f32.mxu1 %vm3587_vm1, %v3588_v4  ;;  %3438 = vmatpush3.bf16.msra.mxu1 %v3437_v48 }
0x1020   :  { %3439 = vmatprep.subr.bf16.mxu1 %v3586_v0 }
0x1023   :  { %3441 = vmatpush3.bf16.msra.mxu1 %v3440_v52 }
0x1024   :  { %3448 = vmatprep.subr.bf16.mxu1 %v3586_v0 }
0x1074   :  { %v1796_v63 = vpop.permute.xlu0 %1795 }
0x1075   :  { %1983 = vst.msk [vmem:[#allocation2] sm:$0xff] %vm46_vm0, %v1796_v63  ;;  %3213 = vmatmul.mubr.msk.f32.vlgmr.msra.gmra.mrb[16].mxu0 %vm46_vm0, %v1796_v63 }
0x1076   :  { %3432 = vmatpush3.bf16.msra.mxu0 %v3966_v60  ;;  %3234 = vmatprep.mubr.msk.f32.mxu0 %vm3587_vm1, %v3588_v4 }
0x1077   :  { %3433 = vmatprep.subr.bf16.mxu0 %v3586_v0 }
0x107a   :  { %3435 = vmatpush3.bf16.msra.mxu0 %v3977_v1 }
0x107b   :  { %3442 = vmatprep.subr.bf16.mxu0 %v3586_v0 }
0x107c   :  { %v1989_v2 = vld [vmem:[#allocation2] sm:$0xff] }
0x107d   :  { %3235 = vmatmul.mubr.msk.f32.vlgmr.msra.gmra.mrb[18].mxu0 %vm46_vm0, %v1989_v2 }
0x107e   :  { %3256 = vmatprep.mubr.msk.f32.mxu0 %vm3587_vm1, %v3588_v4  ;;  %3444 = vmatpush3.bf16.msra.mxu0 %v3443_v33 }
0x107f   :  { %3445 = vmatprep.subr.bf16.mxu0 %v3586_v0 }
0x1082   :  { %3447 = vmatpush3.bf16.msra.mxu0 %v3446_v38 }
0x1083   :  { %3454 = vmatprep.subr.bf16.mxu0 %v3586_v0 }
0x10f1   :  { %v1949_v3 = vpop.f32.mrb[16].mxu1 }
0x10f2   :  { %v1950_v6 = vadd.f32 %v3761_v45, %v1949_v3  ;;  %v3225_v7 = vpop.f32.mrb[17].mxu1 }
0x10f4   :  { %1961 = vrot.lane.b32.xlu1 %v1950_v6, %s3589_s16 }
0x1148   :  { %v1865_v8 = vpop.f32.mrb[16].mxu0 }
0x1149   :  { %v1866_v10 = vadd.f32 %v3783_v51, %v1865_v8  ;;  %v3214_v12 = vpop.f32.mrb[17].mxu0 }
0x114b   :  { %v1953_v13 = vadd.f32 %v1950_v6, %v1866_v10  ;;  %v4065_v6 = vld [vmem:[%s4154_s5] ss:$0 sm:$0xff] }
0x114d   :  { %v2871_v32 = vmul.f32 -1.442695, %v1953_v13 }
0x114f   :  { %3556 = vpow2.f32 %v2871_v32 }
0x1150   :  { %v2071_v37 = vpop.f32.mrb[18].mxu0 }
0x1151   :  { %v2072_v9 = vadd.f32 %v3993_v5, %v2071_v37  ;;  %v3236_v14 = vpop.f32.mrb[19].mxu0 }
0x1153   :  { %2085 = vrot.lane.b32.xlu0 %v2072_v9, %s3589_s16  ;;  %v2077_v18 = vadd.f32 %v2874_v17, %v2072_v9 }
0x1155   :  { %v2875_v19 = vmul.f32 -1.442695, %v2077_v18 }
0x1159   :  { %v3557_v45 = vpop.eup %3556 }
0x115a   :  { %v1957_v15 = vadd.f32 1.0, %v3557_v45 }
0x115c   :  { %3558 = vrcp.f32 %v1957_v15 }
0x115d   :  { %3560 = vpow2.f32 %v2875_v19 }
0x1166   :  { %v3559_v16 = vpop.eup %3558  ;;  %v1962_v51 = vpop.permute.xlu1 %1961 }
0x1167   :  { %v1964_v28 = vmul.f32 %v3559_v16, %v1962_v51  ;;  %v3561_v20 = vpop.eup %3560  ;;  %v1971_v40 = vsub.f32 1.0, %v3559_v16 }
0x1168   :  { %v2081_v36 = vadd.f32 1.0, %v3561_v20 }
0x1169   :  { %1966 = vrot.lane.b32.xlu1 %v1964_v28, %s3589_s16  ;;  %v2883_v28 = vld [vmem:[%s4150_s0 + $0x38] sm:$0xff] }
0x116a   :  { %3562 = vrcp.f32 %v2081_v36 }
0x1174   :  { %v3563_v21 = vpop.eup %3562 }
0x1175   :  { %v2095_v54 = vsub.f32 1.0, %v3563_v21 }
0x11c5   :  { %v2086_v22 = vpop.permute.xlu0 %2085 }
0x11c6   :  { %v2088_v23 = vmul.f32 %v3563_v21, %v2086_v22 }
0x11c8   :  { %2090 = vrot.lane.b32.xlu0 %v2088_v23, %s3589_s16 }
0x11cc   :  { %1977 = vrot.lane.b32.xlu0 %v1667_v57, %s3591_s18 }
0x11d0   :  { %2101 = vrot.lane.b32.xlu0 %v1989_v2, %s3591_s18 }
0x11db   :  { %v1967_v24 = vpop.permute.xlu1 %1966 }
0x11dc   :  { %v1969_v25 = vadd.f32 %v1967_v24, %v1866_v10 }
0x11de   :  { %3564 = vtanh.f32 %v1969_v25 }
0x11e8   :  { %v3565_v26 = vpop.eup %3564 }
0x11e9   :  { %1973 = vrot.lane.b32.xlu1 %v3565_v26, %s3590_s17 }
0x123a   :  { %v2091_v27 = vpop.permute.xlu0 %2090 }
0x123b   :  { %v2093_v29 = vadd.f32 %v2874_v17, %v2091_v27 }
0x123d   :  { %3566 = vtanh.f32 %v2093_v29 }
0x123e   :  { %v1978_v39 = vpop.permute.xlu0 %1977 }
0x123f   :  { %v1980_v46 = vmul.f32 %v3559_v16, %v1978_v39 }
0x1242   :  { %v2102_v53 = vpop.permute.xlu0 %2101 }
0x1243   :  { %v2104_v56 = vmul.f32 %v3563_v21, %v2102_v53 }
0x1247   :  { %v3567_v11 = vpop.eup %3566 }
0x1248   :  { %2097 = vrot.lane.b32.xlu1 %v3567_v11, %s3590_s17 }
0x125b   :  { %v1974_v41 = vpop.permute.xlu1 %1973 }
0x125c   :  { %v1976_v47 = vmul.f32 %v1974_v41, %v1971_v40 }
0x125e   :  { %v1981_v50 = vadd.f32 %v1980_v46, %v1976_v47 }
0x1260   :  { %1985 = vrot.lane.b32.xlu1 %v1981_v50, %s3590_s17 }
0x12ba   :  { %v2098_v55 = vpop.permute.xlu1 %2097 }
0x12bb   :  { %v2100_v57 = vmul.f32 %v2098_v55, %v2095_v54 }
0x12bd   :  { %v2105_v58 = vadd.f32 %v2104_v56, %v2100_v57 }
0x12bf   :  { %2118 = vrot.lane.b32.xlu0 %v2105_v58, %s3590_s17 }
0x12d2   :  { %v1986_v59 = vpop.permute.xlu1 %1985 }
0x12d3   :  { %1988 = vst.msk [vmem:[#allocation3] sm:$0xff] %vm46_vm0, %v1986_v59 }
0x12da   :  { %v1990_v61 = vld [vmem:[#allocation3] sm:$0xff] }
0x12db   :  { %3257 = vmatmul.mubr.msk.f32.vlgmr.msra.gmra.mrb[20].mxu0 %vm46_vm0, %v1990_v61 }
0x12dc   :  { %3456 = vmatpush3.bf16.msra.mxu0 %v3437_v48  ;;  %3278 = vmatprep.mubr.msk.f32.mxu0 %vm3587_vm1, %v3588_v4 }
0x12dd   :  { %3457 = vmatprep.subr.bf16.mxu0 %v3586_v0 }
0x12e0   :  { %3459 = vmatpush3.bf16.msra.mxu0 %v3440_v52 }
0x12e1   :  { %3466 = vmatprep.subr.bf16.mxu0 %v3586_v0 }
0x1331   :  { %v2119_v62 = vpop.permute.xlu0 %2118 }
0x1332   :  { %2306 = vst.msk [vmem:[#allocation2] sm:$0xff] %vm46_vm0, %v2119_v62  ;;  %3246 = vmatmul.mubr.msk.f32.vlgmr.msra.gmra.mrb[18].mxu1 %vm46_vm0, %v2119_v62 }
0x1333   :  { %3450 = vmatpush3.bf16.msra.mxu1 %v3966_v60  ;;  %3267 = vmatprep.mubr.msk.f32.mxu1 %vm3587_vm1, %v3588_v4  ;;  %v4058_v60 = vld [vmem:[%s4153_s7] ss:$0 sm:$0xff] }
0x1334   :  { %3451 = vmatprep.subr.bf16.mxu1 %v3586_v0 }
0x1337   :  { %3453 = vmatpush3.bf16.msra.mxu1 %v3977_v1 }
0x1338   :  { %3460 = vmatprep.subr.bf16.mxu1 %v3586_v0 }
0x1339   :  { %v2312_v63 = vld [vmem:[#allocation2] sm:$0xff] }
0x133a   :  { %3268 = vmatmul.mubr.msk.f32.vlgmr.msra.gmra.mrb[20].mxu1 %vm46_vm0, %v2312_v63 }
0x133b   :  { %3462 = vmatpush3.bf16.msra.mxu1 %v3443_v33  ;;  %3289 = vmatprep.mubr.msk.f32.mxu1 %vm3587_vm1, %v3588_v4 }
0x133c   :  { %3463 = vmatprep.subr.bf16.mxu1 %v3586_v0 }
0x133f   :  { %3465 = vmatpush3.bf16.msra.mxu1 %v3446_v38 }
0x1340   :  { %3472 = vmatprep.subr.bf16.mxu1 %v3586_v0 }
0x13ae   :  { %v2272_v1 = vpop.f32.mrb[20].mxu0 }
0x13af   :  { %v2273_v2 = vadd.f32 %v4058_v60, %v2272_v1  ;;  %v3258_v3 = vpop.f32.mrb[21].mxu0  ;;  %v2640_v1 = vld [vmem:[%s4155_s8 + $0x8] sm:$0xff] }
0x13b0   :  { %v2641_v3 = vld [vmem:[%s4155_s8 + $0x10] sm:$0xff] }
0x13b1   :  { %2284 = vrot.lane.b32.xlu1 %v2273_v2, %s3589_s16 }
0x1405   :  { %v2188_v7 = vpop.f32.mrb[18].mxu1 }
0x1406   :  { %v2189_v8 = vadd.f32 %v4065_v6, %v2188_v7  ;;  %v3247_v10 = vpop.f32.mrb[19].mxu1 }
0x1408   :  { %v2276_v12 = vadd.f32 %v2273_v2, %v2189_v8 }
0x140a   :  { %v2880_v13 = vmul.f32 -1.442695, %v2276_v12 }
0x140c   :  { %3568 = vpow2.f32 %v2880_v13 }
0x140d   :  { %v2394_v32 = vpop.f32.mrb[20].mxu1 }
0x140e   :  { %v2395_v37 = vadd.f32 %v3993_v5, %v2394_v32  ;;  %v3269_v9 = vpop.f32.mrb[21].mxu1 }
0x140f   :  { %v2725_v9 = vld [vmem:[%s4156_s10 + $0x8] sm:$0xff] }
0x1410   :  { %2408 = vrot.lane.b32.xlu0 %v2395_v37, %s3589_s16  ;;  %v2400_v17 = vadd.f32 %v2883_v28, %v2395_v37  ;;  %v2724_v37 = vld [vmem:[%s4156_s10] sm:$0xff] }
0x1412   :  { %v2884_v18 = vmul.f32 -1.442695, %v2400_v17  ;;  %v2729_v17 = vld [vmem:[%s4156_s10 + $0x28] sm:$0xff] }
0x1416   :  { %v3569_v14 = vpop.eup %3568 }
0x1417   :  { %v2280_v45 = vadd.f32 1.0, %v3569_v14  ;;  %v2726_v14 = vld [vmem:[%s4156_s10 + $0x10] sm:$0xff] }
0x1419   :  { %3570 = vrcp.f32 %v2280_v45  ;;  %v3473_v45 = vpack.c.bf16 %v2725_v9, %v2724_v37 }
0x141a   :  { %3572 = vpow2.f32 %v2884_v18 }
0x1423   :  { %v3571_v15 = vpop.eup %3570  ;;  %v2285_v16 = vpop.permute.xlu1 %2284 }
0x1424   :  { %v2287_v51 = vmul.f32 %v3571_v15, %v2285_v16  ;;  %v3573_v19 = vpop.eup %3572  ;;  %v2294_v11 = vsub.f32 1.0, %v3571_v15 }
0x1425   :  { %v2404_v5 = vadd.f32 1.0, %v3573_v19 }
0x1426   :  { %2289 = vrot.lane.b32.xlu1 %v2287_v51, %s3589_s16 }
0x1427   :  { %3574 = vrcp.f32 %v2404_v5 }
0x1431   :  { %v3575_v20 = vpop.eup %3574 }
0x1432   :  { %v2418_v38 = vsub.f32 1.0, %v3575_v20 }
0x1482   :  { %v2409_v36 = vpop.permute.xlu0 %2408 }
0x1483   :  { %v2411_v21 = vmul.f32 %v3575_v20, %v2409_v36  ;;  %v2731_v36 = vld [vmem:[%s4156_s10 + $0x38] sm:$0xff] }
0x1485   :  { %2413 = vrot.lane.b32.xlu0 %v2411_v21, %s3589_s16 }
0x1489   :  { %2300 = vrot.lane.b32.xlu0 %v1990_v61, %s3591_s18 }
0x148d   :  { %2424 = vrot.lane.b32.xlu0 %v2312_v63, %s3591_s18 }
0x1498   :  { %v2290_v22 = vpop.permute.xlu1 %2289 }
0x1499   :  { %v2292_v23 = vadd.f32 %v2290_v22, %v2189_v8 }
0x149b   :  { %3576 = vtanh.f32 %v2292_v23 }
0x14a5   :  { %v3577_v24 = vpop.eup %3576 }
0x14a6   :  { %2296 = vrot.lane.b32.xlu1 %v3577_v24, %s3590_s17 }
0x14f7   :  { %v2414_v25 = vpop.permute.xlu0 %2413 }
0x14f8   :  { %v2416_v26 = vadd.f32 %v2883_v28, %v2414_v25  ;;  %v2728_v28 = vld [vmem:[%s4156_s10 + $0x20] sm:$0xff] }
0x14f9   :  { %v3479_v18 = vpack.c.bf16 %v2729_v17, %v2728_v28 }
0x14fa   :  { %3578 = vtanh.f32 %v2416_v26  ;;  %v2892_v26 = vld [vmem:[%s4158_s11] ss:$0 sm:$0xff] }
0x14fb   :  { %v2301_v29 = vpop.permute.xlu0 %2300 }
0x14fc   :  { %v2303_v31 = vmul.f32 %v3571_v15, %v2301_v29  ;;  %v2727_v15 = vld [vmem:[%s4156_s10 + $0x18] sm:$0xff] }
0x14fd   :  { %v3476_v51 = vpack.c.bf16 %v2727_v15, %v2726_v14 }
0x14ff   :  { %v2425_v35 = vpop.permute.xlu0 %2424 }
0x1500   :  { %v2427_v40 = vmul.f32 %v3575_v20, %v2425_v35  ;;  %v2730_v20 = vld [vmem:[%s4156_s10 + $0x30] sm:$0xff] }
0x1501   :  { %v3482_v21 = vpack.c.bf16 %v2731_v36, %v2730_v20 }
0x1504   :  { %v3579_v27 = vpop.eup %3578 }
0x1505   :  { %2420 = vrot.lane.b32.xlu1 %v3579_v27, %s3590_s17 }
0x1518   :  { %v2297_v30 = vpop.permute.xlu1 %2296 }
0x1519   :  { %v2299_v33 = vmul.f32 %v2297_v30, %v2294_v11 }
0x151b   :  { %v2304_v34 = vadd.f32 %v2303_v31, %v2299_v33 }
0x151d   :  { %2308 = vrot.lane.b32.xlu1 %v2304_v34, %s3590_s17 }
0x1577   :  { %v2421_v39 = vpop.permute.xlu1 %2420 }
0x1578   :  { %v2423_v41 = vmul.f32 %v2421_v39, %v2418_v38 }
0x157a   :  { %v2428_v42 = vadd.f32 %v2427_v40, %v2423_v41 }
0x157c   :  { %2441 = vrot.lane.b32.xlu0 %v2428_v42, %s3590_s17 }
0x158f   :  { %v2309_v43 = vpop.permute.xlu1 %2308 }
0x1590   :  { %2311 = vst.msk [vmem:[#allocation3] sm:$0xff] %vm46_vm0, %v2309_v43 }
0x1597   :  { %v2313_v44 = vld [vmem:[#allocation3] sm:$0xff] }
0x1598   :  { %3290 = vmatmul.mubr.msk.f32.vlgmr.msra.gmra.mrb[22].mxu1 %vm46_vm0, %v2313_v44 }
0x1599   :  { %3319 = vmatprep.mubr.msk.f32.mxu1 %vm3587_vm1, %v3588_v4  ;;  %3474 = vmatpush3.bf16.msra.mxu1 %v3473_v45 }
0x159a   :  { %3475 = vmatprep.subr.bf16.mxu1 %v3586_v0 }
0x159d   :  { %3477 = vmatpush3.bf16.msra.mxu1 %v3476_v51 }
0x159e   :  { %3478 = vmatprep.subr.bf16.mxu1 %v3586_v0 }
0x15a1   :  { %3480 = vmatpush3.bf16.msra.mxu1 %v3479_v18 }
0x15a2   :  { %3481 = vmatprep.subr.bf16.mxu1 %v3586_v0 }
0x15a5   :  { %3483 = vmatpush3.bf16.msra.mxu1 %v3482_v21 }
0x15ee   :  { %v2442_v46 = vpop.permute.xlu0 %2441 }
0x15ef   :  { %2629 = vst.msk [vmem:[#allocation2] sm:$0xff] %vm46_vm0, %v2442_v46  ;;  %3279 = vmatmul.mubr.msk.f32.vlgmr.msra.gmra.mrb[22].mxu0 %vm46_vm0, %v2442_v46 }
0x15f0   :  { %3300 = vmatprep.mubr.msk.f32.mxu0 %vm3587_vm1, %v3588_v4 }
0x166b   :  { %v2595_v47 = vpop.f32.mrb[22].mxu1 }
0x166c   :  { %v2596_v48 = vadd.f32 %v4058_v60, %v2595_v47  ;;  %v3291_v49 = vpop.f32.mrb[23].mxu1  ;;  %v2639_v60 = vld [vmem:[%s4155_s8] sm:$0xff] }
0x166d   :  { %v3467_v2 = vpack.c.bf16 %v2640_v1, %v2639_v60 }
0x166e   :  { %2607 = vrot.lane.b32.xlu1 %v2596_v48, %s3589_s16 }
0x166f   :  { %3468 = vmatpush3.bf16.msra.mxu0 %v3467_v2 }
0x1670   :  { %3469 = vmatprep.subr.bf16.mxu0 %v3586_v0  ;;  %v2890_v0 = vld [vmem:[%s4157_s9] ss:$0 sm:$0xff] }
0x16c2   :  { %v2511_v50 = vpop.f32.mrb[22].mxu0 }
0x16c3   :  { %v2512_v52 = vadd.f32 %v4065_v6, %v2511_v50  ;;  %v3280_v53 = vpop.f32.mrb[23].mxu0  ;;  %v2642_v6 = vld [vmem:[%s4155_s8 + $0x18] sm:$0xff] }
0x16c4   :  { %v3470_v7 = vpack.c.bf16 %v2642_v6, %v2641_v3 }
0x16c5   :  { %v2599_v54 = vadd.f32 %v2596_v48, %v2512_v52 }
0x16c6   :  { %3471 = vmatpush3.bf16.msra.mxu0 %v3470_v7 }
0x16c7   :  { %v2889_v55 = vmul.f32 -1.442695, %v2599_v54 }
0x16c9   :  { %3580 = vpow2.f32 %v2889_v55 }
0x16d3   :  { %v3581_v56 = vpop.eup %3580 }
0x16d4   :  { %v2603_v57 = vadd.f32 1.0, %v3581_v56 }
0x16d6   :  { %3582 = vrcp.f32 %v2603_v57 }
0x16e0   :  { %v3583_v58 = vpop.eup %3582  ;;  %v2608_v59 = vpop.permute.xlu1 %2607 }
0x16e1   :  { %v2610_v61 = vmul.f32 %v3583_v58, %v2608_v59  ;;  %v2617_v10 = vsub.f32 1.0, %v3583_v58 }
0x16e3   :  { %2612 = vrot.lane.b32.xlu0 %v2610_v61, %s3589_s16 }
0x16e7   :  { %2623 = vrot.lane.b32.xlu0 %v2313_v44, %s3591_s18 }
0x1755   :  { %v2613_v4 = vpop.permute.xlu0 %2612 }
0x1756   :  { %v2615_v62 = vadd.f32 %v2613_v4, %v2512_v52 }
0x1758   :  { %3584 = vtanh.f32 %v2615_v62 }
0x1759   :  { %v2624_v8 = vpop.permute.xlu0 %2623 }
0x175a   :  { %v2626_v13 = vmul.f32 %v3583_v58, %v2624_v8 }
0x1762   :  { %v3585_v63 = vpop.eup %3584 }
0x1763   :  { %2619 = vrot.lane.b32.xlu1 %v3585_v63, %s3590_s17 }
0x17d5   :  { %v2620_v12 = vpop.permute.xlu1 %2619 }
0x17d6   :  { %v2622_v32 = vmul.f32 %v2620_v12, %v2617_v10 }
0x17d8   :  { %v2627_v16 = vadd.f32 %v2626_v13, %v2622_v32 }
0x17da   :  { %2631 = vrot.lane.b32.xlu1 %v2627_v16, %s3590_s17 }
0x184c   :  { %v2632_v19 = vpop.permute.xlu1 %2631 }
0x184d   :  { %2634 = vst.msk [vmem:[#allocation3] sm:$0xff] %vm46_vm0, %v2632_v19 }
0x1854   :  { %v2638_v5 = vld [vmem:[#allocation3] sm:$0xff] }
0x1855   :  { %3301 = vmatmul.mubr.msk.f32.vlgmr.msra.gmra.mrb[24].mxu0 %vm46_vm0, %v2638_v5 }
0x1928   :  { %v2719_v22 = vpop.f32.mrb[24].mxu0 }
0x1929   :  { %v2720_v23 = vadd.f32 %v2890_v0, %v2719_v22  ;;  %v3302_v24 = vpop.f32.mrb[25].mxu0 }
0x192b   :  { %v2723_v25 = vmax.f32 %v2720_v23, 0.0 }
0x192d   :  { %3320 = vmatmul.mubr.msk.f32.vlgmr.msra.gmra.mrb[24].mxu1 %vm2739_vm2, %v2723_v25 }
0x1a00   :  { %v2809_v27 = vpop.f32.mrb[24].mxu1 }
0x1a01   :  { %v2810_v29 = vadd.f32 %v2892_v26, %v2809_v27  ;;  %v3321_v11 = vpop.f32.mrb[25].mxu1 }
0x1a03   :  { %2813 = vst [vmem:[%s4159_s12] sm:$0xff] %v2810_v29 }

</bundles_post_ra>
